<compile_context>
chip_gen: v5e
topology: v5e:2x2
jax: 0.10.0
libtpu: 0.0.40
codegen_flags: <defaults>
</compile_context>

<pallas_src>
import jax
import jax.numpy as jnp
from jax.experimental import pallas as pl
from jax.experimental.pallas import tpu as pltpu

LANE = 128   # lane width / feature-dim padding granularity
TM = 128     # node-row tile (output rows of the aggregation)
TK = 128     # Ahat-column (reduction) tile


def _round_up(x, m):
    return (x + m - 1) // m * m


# ----------------------------- Pallas kernel ------------------------------

def _fused_gnn_kernel(a_ref, x_ref,
                      w1_ref, b1_ref, w2_ref, b2_ref, w3_ref, b3_ref,
                      wl_ref, bl_ref, wc_ref, bc_ref,
                      o_ref, h1_ref, h2_ref, acc_ref):
    s = pl.program_id(0)            # GCN stage (0..2)
    i = pl.program_id(1)            # node-row tile
    k = pl.program_id(2)            # Ahat column (reduction) tile
    nk = pl.num_programs(2)

    # One-time zero of the activation scratch (only its "unselected" reads at
    # stage 0 touch it; zeroing keeps everything well defined).
    @pl.when((s == 0) & (i == 0) & (k == 0))
    def _():
        h1_ref[...] = jnp.zeros_like(h1_ref)
        h2_ref[...] = jnp.zeros_like(h2_ref)

    # Reset the f32 aggregation accumulator at the start of every reduction.
    @pl.when(k == 0)
    def _():
        acc_ref[...] = jnp.zeros_like(acc_ref)

    # Previous-layer activations for this reduction tile:
    #   stage 0 -> padded input x, stage 1 -> h1, stage 2 -> h2.
    rk = pl.multiple_of(k * TK, TK)
    prev_x = x_ref[pl.ds(rk, TK), :]
    prev_1 = h1_ref[pl.ds(rk, TK), :]
    prev_2 = h2_ref[pl.ds(rk, TK), :]
    prev = jnp.where(s == 0, prev_x, jnp.where(s == 1, prev_1, prev_2))

    # Aggregate at the narrow (128-wide) feature width: acc += A_blk @ h_prev_blk.
    acc_ref[...] += jnp.dot(a_ref[...], prev, preferred_element_type=jnp.float32)

    # Epilogue: apply the layer's weight/bias/ReLU once per row tile.
    @pl.when(k == nk - 1)
    def _():
        ri = pl.multiple_of(i * TM, TM)
        agg = acc_ref[...].astype(jnp.bfloat16)      # (TM, 128)

        @pl.when(s == 0)
        def _():
            h = jnp.dot(agg, w1_ref[...], preferred_element_type=jnp.float32) + b1_ref[...]
            h1_ref[pl.ds(ri, TM), :] = jnp.maximum(h, 0.0).astype(jnp.bfloat16)

        @pl.when(s == 1)
        def _():
            h = jnp.dot(agg, w2_ref[...], preferred_element_type=jnp.float32) + b2_ref[...]
            h2_ref[pl.ds(ri, TM), :] = jnp.maximum(h, 0.0).astype(jnp.bfloat16)

        @pl.when(s == 2)
        def _():
            # Third GCN layer + both dense layers fused into one epilogue.
            h3 = jnp.maximum(
                jnp.dot(agg, w3_ref[...], preferred_element_type=jnp.float32)
                + b3_ref[...], 0.0)
            h4 = jnp.maximum(
                jnp.dot(h3.astype(jnp.bfloat16), wl_ref[...],
                        preferred_element_type=jnp.float32) + bl_ref[...], 0.0)
            out = (jnp.dot(h4.astype(jnp.bfloat16), wc_ref[...],
                           preferred_element_type=jnp.float32) + bc_ref[...])
            o_ref[pl.ds(ri, TM), :] = out.astype(o_ref.dtype)


# ------------------------------ glue (JAX) --------------------------------

def build_normalized_adjacency(edge_index, num_nodes):
    """Dense GCN-normalized adjacency D^{-1/2}(A+I)D^{-1/2}.

    Matches PyG gcn_norm: duplicate edges scatter-add; self loops are added only
    for nodes that do not already have one."""
    src, dst = edge_index[0], edge_index[1]
    a = jnp.zeros((num_nodes, num_nodes), jnp.float32).at[dst, src].add(1.0)
    diag = jnp.diagonal(a)
    a = a + jnp.diag(jnp.where(diag > 0, 0.0, 1.0))
    deg = a.sum(axis=1)
    d_inv_sqrt = jnp.where(deg > 0, jax.lax.rsqrt(deg), 0.0)
    return d_inv_sqrt[:, None] * a * d_inv_sqrt[None, :]


def init_params(key, input_dim, hidden_dim, integration_dim, output_dim):
    """Weights stored as (F_in, F_out) bf16, padded to 128-lane multiples.
    Biases stored as (1, F_out) f32 (epilogue stays in f32)."""
    assert input_dim <= hidden_dim, "input features are padded up to hidden_dim"
    assert hidden_dim % LANE == 0 and integration_dim % LANE == 0
    out_p = _round_up(output_dim, LANE)
    ks = jax.random.split(key, 8)

    def lin_w(kw, fi, fo, fi_pad, fo_pad):
        scale = 1.0 / jnp.sqrt(jnp.float32(fi))
        w = jax.random.uniform(kw, (fi, fo), jnp.float32, -scale, scale)
        return jnp.zeros((fi_pad, fo_pad), jnp.float32).at[:fi, :fo].set(w).astype(jnp.bfloat16)

    def lin_b(kb, fi, fo, fo_pad):
        scale = 1.0 / jnp.sqrt(jnp.float32(fi))
        b = jax.random.uniform(kb, (1, fo), jnp.float32, -scale, scale)
        return jnp.zeros((1, fo_pad), jnp.float32).at[:, :fo].set(b)

    return {
        # GCNConv weights (bias init = 0, like PyG GCNConv)
        "w1": lin_w(ks[0], input_dim, hidden_dim, hidden_dim, hidden_dim),
        "b1": jnp.zeros((1, hidden_dim), jnp.float32),
        "w2": lin_w(ks[1], hidden_dim, hidden_dim, hidden_dim, hidden_dim),
        "b2": jnp.zeros((1, hidden_dim), jnp.float32),
        "w3": lin_w(ks[2], hidden_dim, integration_dim, hidden_dim, integration_dim),
        "b3": jnp.zeros((1, integration_dim), jnp.float32),
        # integration_linear / classifier (uniform bias, like torch.nn.Linear)
        "wl": lin_w(ks[3], integration_dim, integration_dim, integration_dim, integration_dim),
        "bl": lin_b(ks[4], integration_dim, integration_dim, integration_dim),
        "wc": lin_w(ks[5], integration_dim, output_dim, integration_dim, out_p),
        "bc": lin_b(ks[6], integration_dim, output_dim, out_p),
    }


def gnn_classifier_forward(params, x, a_hat, output_dim):
    n, f_in = x.shape
    hid = params["w1"].shape[0]
    idim = params["w3"].shape[1]
    out_p = params["wc"].shape[1]
    n_p = _round_up(n, TM)

    # Pad nodes to a tile multiple and features to the 128-lane hidden width; bf16.
    a_p = jnp.zeros((n_p, n_p), jnp.bfloat16).at[:n, :n].set(a_hat.astype(jnp.bfloat16))
    x_p = jnp.zeros((n_p, hid), jnp.bfloat16).at[:n, :f_in].set(x.astype(jnp.bfloat16))

    grid = (3, n_p // TM, n_p // TK)

    def full(shape):
        return pl.BlockSpec(shape, lambda s, i, k: (0,) * len(shape))

    out_padded = pl.pallas_call(
        _fused_gnn_kernel,
        out_shape=jax.ShapeDtypeStruct((n_p, out_p), jnp.float32),
        grid_spec=pltpu.PrefetchScalarGridSpec(
            num_scalar_prefetch=0,
            grid=grid,
            in_specs=[
                pl.BlockSpec((TM, TK), lambda s, i, k: (i, k)),  # Ahat tiles (streamed)
                full((n_p, hid)),                                 # x (resident)
                full((hid, hid)), full((1, hid)),                 # W1, b1
                full((hid, hid)), full((1, hid)),                 # W2, b2
                full((hid, idim)), full((1, idim)),               # W3, b3
                full((idim, idim)), full((1, idim)),              # Wl, bl
                full((idim, out_p)), full((1, out_p)),            # Wc, bc (lane-padded)
            ],
            out_specs=pl.BlockSpec((n_p, out_p), lambda s, i, k: (0, 0)),
            scratch_shapes=[
                pltpu.VMEM((n_p, hid), jnp.bfloat16),   # h1 (persists across stages)
                pltpu.VMEM((n_p, hid), jnp.bfloat16),   # h2
                pltpu.VMEM((TM, hid), jnp.float32),     # aggregation accumulator
            ],
        ),
        compiler_params=pltpu.CompilerParams(
            # All axes must be "arbitrary": later stages read every row of the
            # shared VMEM activation scratch written by earlier stages.
            dimension_semantics=("arbitrary", "arbitrary", "arbitrary"),
            vmem_limit_bytes=32 * 1024 * 1024,
        ),
    )(a_p, x_p,
      params["w1"], params["b1"], params["w2"], params["b2"],
      params["w3"], params["b3"], params["wl"], params["bl"],
      params["wc"], params["bc"])

    return out_padded[:n, :output_dim]


def gnn_classifier_reference(params, x, a_hat, output_dim):
    """Pure-JAX reference mirroring the kernel's bf16-operand / f32-accumulate math."""
    bf16, f32 = jnp.bfloat16, jnp.float32
    a = a_hat.astype(bf16)
    h = jnp.zeros((x.shape[0], params["w1"].shape[0]), bf16).at[:, :x.shape[1]].set(
        x.astype(bf16))

    def gcn(h_prev, w, b):
        agg = jnp.dot(a, h_prev, preferred_element_type=f32).astype(bf16)
        return jnp.maximum(jnp.dot(agg, w, preferred_element_type=f32) + b, 0.0)

    h = gcn(h, params["w1"], params["b1"]).astype(bf16)
    h = gcn(h, params["w2"], params["b2"]).astype(bf16)
    h3 = gcn(h, params["w3"], params["b3"])                       # f32
    h4 = jnp.maximum(
        jnp.dot(h3.astype(bf16), params["wl"], preferred_element_type=f32)
        + params["bl"], 0.0)
    out = (jnp.dot(h4.astype(bf16), params["wc"], preferred_element_type=f32)
           + params["bc"])
    return out[:, :output_dim]


# --------------------------------- main ------------------------------------

if __name__ == "__main__":
    NUM_NODES = 256
    INPUT_DIM = 64          # padded to 128 lanes inside
    HIDDEN_DIM = 128
    INTEGRATION_DIM = 256
    OUTPUT_DIM = 3          # computed into a 128-lane slab, sliced outside
    NUM_EDGES = 1024

    key = jax.random.PRNGKey(0)
    k_x, k_e, k_p = jax.random.split(key, 3)

    x = jax.random.normal(k_x, (NUM_NODES, INPUT_DIM), jnp.float32)
    edge_index = jax.random.randint(k_e, (2, NUM_EDGES), 0, NUM_NODES, jnp.int32)
    a_hat = build_normalized_adjacency(edge_index, NUM_NODES)

    params = init_params(k_p, INPUT_DIM, HIDDEN_DIM, INTEGRATION_DIM, OUTPUT_DIM)

    out = gnn_classifier_forward(params, x, a_hat, OUTPUT_DIM)
    out = jax.block_until_ready(out)

    ref = gnn_classifier_reference(params, x, a_hat, OUTPUT_DIM)
    assert out.shape == (NUM_NODES, OUTPUT_DIM)
    max_err = float(jnp.max(jnp.abs(out - ref)))
    assert jnp.allclose(out, ref, atol=1e-2, rtol=1e-2), f"max abs err = {max_err}"

    print("KERNEL_OK")
</pallas_src>

<mosaic_0001>
module attributes {stable_mosaic.version = 11 : i64} {
  func.func @_fused_gnn_kernel(%arg0: i32, %arg1: i32, %arg2: i32, %arg3: memref<128x128xbf16, #tpu.memory_space<vmem>>, %arg4: memref<256x128xbf16, #tpu.memory_space<vmem>>, %arg5: memref<128x128xbf16, #tpu.memory_space<vmem>>, %arg6: memref<1x128xf32, #tpu.memory_space<vmem>>, %arg7: memref<128x128xbf16, #tpu.memory_space<vmem>>, %arg8: memref<1x128xf32, #tpu.memory_space<vmem>>, %arg9: memref<128x256xbf16, #tpu.memory_space<vmem>>, %arg10: memref<1x256xf32, #tpu.memory_space<vmem>>, %arg11: memref<256x256xbf16, #tpu.memory_space<vmem>>, %arg12: memref<1x256xf32, #tpu.memory_space<vmem>>, %arg13: memref<256x128xbf16, #tpu.memory_space<vmem>>, %arg14: memref<1x128xf32, #tpu.memory_space<vmem>>, %arg15: memref<256x128xf32, #tpu.memory_space<vmem>>, %arg16: memref<256x128xbf16, #tpu.memory_space<vmem>>, %arg17: memref<256x128xbf16, #tpu.memory_space<vmem>>, %arg18: memref<128x128xf32, #tpu.memory_space<vmem>>) attributes {dimension_semantics = [#tpu.dimension_semantics<arbitrary>, #tpu.dimension_semantics<arbitrary>, #tpu.dimension_semantics<arbitrary>], iteration_bounds = array<i64: 3, 2, 2>, scalar_prefetch = 0 : i64, scratch_operands = 3 : i64, tpu.core_type = #tpu.core_type<tc>, window_params = [{transform_indices = @transform_0, window_bounds = array<i64: 128, 128>}, {pipeline_mode = #tpu.pipeline_mode<synchronous>, transform_indices = @transform_1, window_bounds = array<i64: 256, 128>}, {pipeline_mode = #tpu.pipeline_mode<synchronous>, transform_indices = @transform_2, window_bounds = array<i64: 128, 128>}, {pipeline_mode = #tpu.pipeline_mode<synchronous>, transform_indices = @transform_3, window_bounds = array<i64: 1, 128>}, {pipeline_mode = #tpu.pipeline_mode<synchronous>, transform_indices = @transform_4, window_bounds = array<i64: 128, 128>}, {pipeline_mode = #tpu.pipeline_mode<synchronous>, transform_indices = @transform_5, window_bounds = array<i64: 1, 128>}, {pipeline_mode = #tpu.pipeline_mode<synchronous>, transform_indices = @transform_6, window_bounds = array<i64: 128, 256>}, {pipeline_mode = #tpu.pipeline_mode<synchronous>, transform_indices = @transform_7, window_bounds = array<i64: 1, 256>}, {pipeline_mode = #tpu.pipeline_mode<synchronous>, transform_indices = @transform_8, window_bounds = array<i64: 256, 256>}, {pipeline_mode = #tpu.pipeline_mode<synchronous>, transform_indices = @transform_9, window_bounds = array<i64: 1, 256>}, {pipeline_mode = #tpu.pipeline_mode<synchronous>, transform_indices = @transform_10, window_bounds = array<i64: 256, 128>}, {pipeline_mode = #tpu.pipeline_mode<synchronous>, transform_indices = @transform_11, window_bounds = array<i64: 1, 128>}, {pipeline_mode = #tpu.pipeline_mode<synchronous>, transform_indices = @transform_12, window_bounds = array<i64: 256, 128>}]} {
    %c0_i32 = arith.constant 0 : i32
    %0 = arith.cmpi eq, %arg0, %c0_i32 : i32
    %c0_i32_0 = arith.constant 0 : i32
    %1 = arith.cmpi eq, %arg1, %c0_i32_0 : i32
    %2 = arith.andi %0, %1 : i1
    %c0_i32_1 = arith.constant 0 : i32
    %3 = arith.cmpi eq, %arg2, %c0_i32_1 : i32
    %4 = arith.andi %2, %3 : i1
    %5 = arith.extui %4 : i1 to i32
    %c0_i32_2 = arith.constant 0 : i32
    %6 = arith.cmpi ne, %5, %c0_i32_2 : i32
    scf.if %6 {
      %cst_16 = arith.constant 0.000000e+00 : bf16
      %30 = vector.broadcast %cst_16 : bf16 to vector<256x128xbf16>
      %c0_17 = arith.constant 0 : index
      %c0_18 = arith.constant 0 : index
      %31 = vector.load %arg16[%c0_17, %c0_18] : memref<256x128xbf16, #tpu.memory_space<vmem>>, vector<256x128xbf16>
      tpu.vector_store %arg16[%c0_17, %c0_18], %30 {strides = array<i32>} : memref<256x128xbf16, #tpu.memory_space<vmem>>, vector<256x128xbf16>,
      %cst_19 = arith.constant 0.000000e+00 : bf16
      %32 = vector.broadcast %cst_19 : bf16 to vector<256x128xbf16>
      %c0_20 = arith.constant 0 : index
      %c0_21 = arith.constant 0 : index
      %33 = vector.load %arg17[%c0_20, %c0_21] : memref<256x128xbf16, #tpu.memory_space<vmem>>, vector<256x128xbf16>
      tpu.vector_store %arg17[%c0_20, %c0_21], %32 {strides = array<i32>} : memref<256x128xbf16, #tpu.memory_space<vmem>>, vector<256x128xbf16>,
    } else {
    }
    %c0_i32_3 = arith.constant 0 : i32
    %7 = arith.cmpi eq, %arg2, %c0_i32_3 : i32
    %8 = arith.extui %7 : i1 to i32
    %c0_i32_4 = arith.constant 0 : i32
    %9 = arith.cmpi ne, %8, %c0_i32_4 : i32
    scf.if %9 {
      %cst_16 = arith.constant 0.000000e+00 : f32
      %30 = vector.broadcast %cst_16 : f32 to vector<128x128xf32>
      %c0_17 = arith.constant 0 : index
      %c0_18 = arith.constant 0 : index
      %31 = vector.load %arg18[%c0_17, %c0_18] : memref<128x128xf32, #tpu.memory_space<vmem>>, vector<128x128xf32>
      tpu.vector_store %arg18[%c0_17, %c0_18], %30 {strides = array<i32>} : memref<128x128xf32, #tpu.memory_space<vmem>>, vector<128x128xf32>,
    } else {
    }
    %c128_i32 = arith.constant 128 : i32
    %10 = arith.muli %arg2, %c128_i32 : i32
    %11 = tpu.assume_multiple %10, 128 : i32
    %12 = arith.index_cast %11 : i32 to index
    %c0 = arith.constant 0 : index
    %13 = vector.load %arg4[%12, %c0] : memref<256x128xbf16, #tpu.memory_space<vmem>>, vector<128x128xbf16>
    %14 = arith.index_cast %11 : i32 to index
    %c0_5 = arith.constant 0 : index
    %15 = vector.load %arg16[%14, %c0_5] : memref<256x128xbf16, #tpu.memory_space<vmem>>, vector<128x128xbf16>
    %16 = arith.index_cast %11 : i32 to index
    %c0_6 = arith.constant 0 : index
    %17 = vector.load %arg17[%16, %c0_6] : memref<256x128xbf16, #tpu.memory_space<vmem>>, vector<128x128xbf16>
    %c0_i32_7 = arith.constant 0 : i32
    %18 = arith.cmpi eq, %arg0, %c0_i32_7 : i32
    %c1_i32 = arith.constant 1 : i32
    %19 = arith.cmpi eq, %arg0, %c1_i32 : i32
    %20 = arith.select %19, %15, %17 : vector<128x128xbf16>
    %21 = arith.select %18, %13, %20 : vector<128x128xbf16>
    %c0_8 = arith.constant 0 : index
    %c0_9 = arith.constant 0 : index
    %22 = vector.load %arg18[%c0_8, %c0_9] : memref<128x128xf32, #tpu.memory_space<vmem>>, vector<128x128xf32>
    %c0_10 = arith.constant 0 : index
    %c0_11 = arith.constant 0 : index
    %23 = vector.load %arg3[%c0_10, %c0_11] : memref<128x128xbf16, #tpu.memory_space<vmem>>, vector<128x128xbf16>
    %cst = arith.constant dense<0.000000e+00> : vector<128x128xf32>
    %24 = tpu.matmul %23, %21, %cst {dimension_numbers = #tpu.dot_dimension_numbers<[1], [0], [0], [1], [0, 0, 1, 1], [], []>} : vector<128x128xbf16>, vector<128x128xbf16>, vector<128x128xf32> -> vector<128x128xf32>
    %25 = arith.addf %22, %24 : vector<128x128xf32>
    %c0_12 = arith.constant 0 : index
    %c0_13 = arith.constant 0 : index
    %26 = vector.load %arg18[%c0_12, %c0_13] : memref<128x128xf32, #tpu.memory_space<vmem>>, vector<128x128xf32>
    tpu.vector_store %arg18[%c0_12, %c0_13], %25 {strides = array<i32>} : memref<128x128xf32, #tpu.memory_space<vmem>>, vector<128x128xf32>,
    %c1_i32_14 = arith.constant 1 : i32
    %27 = arith.cmpi eq, %arg2, %c1_i32_14 : i32
    %28 = arith.extui %27 : i1 to i32
    %c0_i32_15 = arith.constant 0 : i32
    %29 = arith.cmpi ne, %28, %c0_i32_15 : i32
    scf.if %29 {
      %c128_i32_16 = arith.constant 128 : i32
      %30 = arith.muli %arg1, %c128_i32_16 : i32
      %31 = tpu.assume_multiple %30, 128 : i32
      %c0_17 = arith.constant 0 : index
      %c0_18 = arith.constant 0 : index
      %32 = vector.load %arg18[%c0_17, %c0_18] : memref<128x128xf32, #tpu.memory_space<vmem>>, vector<128x128xf32>
      %33 = arith.truncf %32 : vector<128x128xf32> to vector<128x128xbf16>
      %c0_i32_19 = arith.constant 0 : i32
      %34 = arith.cmpi eq, %arg0, %c0_i32_19 : i32
      %35 = arith.extui %34 : i1 to i32
      %c0_i32_20 = arith.constant 0 : i32
      %36 = arith.cmpi ne, %35, %c0_i32_20 : i32
      scf.if %36 {
        %c0_24 = arith.constant 0 : index
        %c0_25 = arith.constant 0 : index
        %43 = vector.load %arg5[%c0_24, %c0_25] : memref<128x128xbf16, #tpu.memory_space<vmem>>, vector<128x128xbf16>
        %cst_26 = arith.constant dense<0.000000e+00> : vector<128x128xf32>
        %44 = tpu.matmul %33, %43, %cst_26 {dimension_numbers = #tpu.dot_dimension_numbers<[1], [0], [0], [1], [0, 0, 1, 1], [], []>} : vector<128x128xbf16>, vector<128x128xbf16>, vector<128x128xf32> -> vector<128x128xf32>
        %c0_27 = arith.constant 0 : index
        %c0_28 = arith.constant 0 : index
        %45 = vector.load %arg6[%c0_27, %c0_28] : memref<1x128xf32, #tpu.memory_space<vmem>>, vector<1x128xf32>
        %46 = vector.broadcast %45 : vector<1x128xf32> to vector<128x128xf32>
        %47 = arith.addf %44, %46 : vector<128x128xf32>
        %cst_29 = arith.constant 0.000000e+00 : f32
        %48 = vector.broadcast %cst_29 : f32 to vector<128x128xf32>
        %49 = arith.maximumf %47, %48 : vector<128x128xf32>
        %50 = arith.truncf %49 : vector<128x128xf32> to vector<128x128xbf16>
        %51 = arith.index_cast %31 : i32 to index
        %c0_30 = arith.constant 0 : index
        %52 = vector.load %arg16[%51, %c0_30] : memref<256x128xbf16, #tpu.memory_space<vmem>>, vector<128x128xbf16>
        tpu.vector_store %arg16[%51, %c0_30], %50 {strides = array<i32>} : memref<256x128xbf16, #tpu.memory_space<vmem>>, vector<128x128xbf16>,
      } else {
      }
      %c1_i32_21 = arith.constant 1 : i32
      %37 = arith.cmpi eq, %arg0, %c1_i32_21 : i32
      %38 = arith.extui %37 : i1 to i32
      %c0_i32_22 = arith.constant 0 : i32
      %39 = arith.cmpi ne, %38, %c0_i32_22 : i32
      scf.if %39 {
        %c0_24 = arith.constant 0 : index
        %c0_25 = arith.constant 0 : index
        %43 = vector.load %arg7[%c0_24, %c0_25] : memref<128x128xbf16, #tpu.memory_space<vmem>>, vector<128x128xbf16>
        %cst_26 = arith.constant dense<0.000000e+00> : vector<128x128xf32>
        %44 = tpu.matmul %33, %43, %cst_26 {dimension_numbers = #tpu.dot_dimension_numbers<[1], [0], [0], [1], [0, 0, 1, 1], [], []>} : vector<128x128xbf16>, vector<128x128xbf16>, vector<128x128xf32> -> vector<128x128xf32>
        %c0_27 = arith.constant 0 : index
        %c0_28 = arith.constant 0 : index
        %45 = vector.load %arg8[%c0_27, %c0_28] : memref<1x128xf32, #tpu.memory_space<vmem>>, vector<1x128xf32>
        %46 = vector.broadcast %45 : vector<1x128xf32> to vector<128x128xf32>
        %47 = arith.addf %44, %46 : vector<128x128xf32>
        %cst_29 = arith.constant 0.000000e+00 : f32
        %48 = vector.broadcast %cst_29 : f32 to vector<128x128xf32>
        %49 = arith.maximumf %47, %48 : vector<128x128xf32>
        %50 = arith.truncf %49 : vector<128x128xf32> to vector<128x128xbf16>
        %51 = arith.index_cast %31 : i32 to index
        %c0_30 = arith.constant 0 : index
        %52 = vector.load %arg17[%51, %c0_30] : memref<256x128xbf16, #tpu.memory_space<vmem>>, vector<128x128xbf16>
        tpu.vector_store %arg17[%51, %c0_30], %50 {strides = array<i32>} : memref<256x128xbf16, #tpu.memory_space<vmem>>, vector<128x128xbf16>,
      } else {
      }
      %c2_i32 = arith.constant 2 : i32
      %40 = arith.cmpi eq, %arg0, %c2_i32 : i32
      %41 = arith.extui %40 : i1 to i32
      %c0_i32_23 = arith.constant 0 : i32
      %42 = arith.cmpi ne, %41, %c0_i32_23 : i32
      scf.if %42 {
        %c0_24 = arith.constant 0 : index
        %c0_25 = arith.constant 0 : index
        %43 = vector.load %arg9[%c0_24, %c0_25] : memref<128x256xbf16, #tpu.memory_space<vmem>>, vector<128x256xbf16>
        %cst_26 = arith.constant dense<0.000000e+00> : vector<128x256xf32>
        %44 = tpu.matmul %33, %43, %cst_26 {dimension_numbers = #tpu.dot_dimension_numbers<[1], [0], [0], [1], [0, 0, 1, 1], [], []>} : vector<128x128xbf16>, vector<128x256xbf16>, vector<128x256xf32> -> vector<128x256xf32>
        %c0_27 = arith.constant 0 : index
        %c0_28 = arith.constant 0 : index
        %45 = vector.load %arg10[%c0_27, %c0_28] : memref<1x256xf32, #tpu.memory_space<vmem>>, vector<1x256xf32>
        %46 = vector.broadcast %45 : vector<1x256xf32> to vector<128x256xf32>
        %47 = arith.addf %44, %46 : vector<128x256xf32>
        %cst_29 = arith.constant 0.000000e+00 : f32
        %48 = vector.broadcast %cst_29 : f32 to vector<128x256xf32>
        %49 = arith.maximumf %47, %48 : vector<128x256xf32>
        %50 = arith.truncf %49 : vector<128x256xf32> to vector<128x256xbf16>
        %c0_30 = arith.constant 0 : index
        %c0_31 = arith.constant 0 : index
        %51 = vector.load %arg11[%c0_30, %c0_31] : memref<256x256xbf16, #tpu.memory_space<vmem>>, vector<256x256xbf16>
        %cst_32 = arith.constant dense<0.000000e+00> : vector<128x256xf32>
        %52 = tpu.matmul %50, %51, %cst_32 {dimension_numbers = #tpu.dot_dimension_numbers<[1], [0], [0], [1], [0, 0, 1, 1], [], []>} : vector<128x256xbf16>, vector<256x256xbf16>, vector<128x256xf32> -> vector<128x256xf32>
        %c0_33 = arith.constant 0 : index
        %c0_34 = arith.constant 0 : index
        %53 = vector.load %arg12[%c0_33, %c0_34] : memref<1x256xf32, #tpu.memory_space<vmem>>, vector<1x256xf32>
        %54 = vector.broadcast %53 : vector<1x256xf32> to vector<128x256xf32>
        %55 = arith.addf %52, %54 : vector<128x256xf32>
        %cst_35 = arith.constant 0.000000e+00 : f32
        %56 = vector.broadcast %cst_35 : f32 to vector<128x256xf32>
        %57 = arith.maximumf %55, %56 : vector<128x256xf32>
        %58 = arith.truncf %57 : vector<128x256xf32> to vector<128x256xbf16>
        %c0_36 = arith.constant 0 : index
        %c0_37 = arith.constant 0 : index
        %59 = vector.load %arg13[%c0_36, %c0_37] : memref<256x128xbf16, #tpu.memory_space<vmem>>, vector<256x128xbf16>
        %cst_38 = arith.constant dense<0.000000e+00> : vector<128x128xf32>
        %60 = tpu.matmul %58, %59, %cst_38 {dimension_numbers = #tpu.dot_dimension_numbers<[1], [0], [0], [1], [0, 0, 1, 1], [], []>} : vector<128x256xbf16>, vector<256x128xbf16>, vector<128x128xf32> -> vector<128x128xf32>
        %c0_39 = arith.constant 0 : index
        %c0_40 = arith.constant 0 : index
        %61 = vector.load %arg14[%c0_39, %c0_40] : memref<1x128xf32, #tpu.memory_space<vmem>>, vector<1x128xf32>
        %62 = vector.broadcast %61 : vector<1x128xf32> to vector<128x128xf32>
        %63 = arith.addf %60, %62 : vector<128x128xf32>
        %64 = arith.index_cast %31 : i32 to index
        %c0_41 = arith.constant 0 : index
        %65 = vector.load %arg15[%64, %c0_41] : memref<256x128xf32, #tpu.memory_space<vmem>>, vector<128x128xf32>
        tpu.vector_store %arg15[%64, %c0_41], %63 {strides = array<i32>} : memref<256x128xf32, #tpu.memory_space<vmem>>, vector<128x128xf32>,
      } else {
      }
    } else {
    }
    return
  }
  func.func @transform_0(%arg0: i32, %arg1: i32, %arg2: i32) -> (i32, i32) {
    %c0_i32 = arith.constant 0 : i32
    return %arg1, %arg2 : i32, i32
  }
  func.func @transform_1(%arg0: i32, %arg1: i32, %arg2: i32) -> (i32, i32) {
    %c0_i32 = arith.constant 0 : i32
    %c0_i32_0 = arith.constant 0 : i32
    %c0_i32_1 = arith.constant 0 : i32
    return %c0_i32, %c0_i32_0 : i32, i32
  }
  func.func @transform_2(%arg0: i32, %arg1: i32, %arg2: i32) -> (i32, i32) {
    %c0_i32 = arith.constant 0 : i32
    %c0_i32_0 = arith.constant 0 : i32
    %c0_i32_1 = arith.constant 0 : i32
    return %c0_i32, %c0_i32_0 : i32, i32
  }
  func.func @transform_3(%arg0: i32, %arg1: i32, %arg2: i32) -> (i32, i32) {
    %c0_i32 = arith.constant 0 : i32
    %c0_i32_0 = arith.constant 0 : i32
    %c0_i32_1 = arith.constant 0 : i32
    return %c0_i32, %c0_i32_0 : i32, i32
  }
  func.func @transform_4(%arg0: i32, %arg1: i32, %arg2: i32) -> (i32, i32) {
    %c0_i32 = arith.constant 0 : i32
    %c0_i32_0 = arith.constant 0 : i32
    %c0_i32_1 = arith.constant 0 : i32
    return %c0_i32, %c0_i32_0 : i32, i32
  }
  func.func @transform_5(%arg0: i32, %arg1: i32, %arg2: i32) -> (i32, i32) {
    %c0_i32 = arith.constant 0 : i32
    %c0_i32_0 = arith.constant 0 : i32
    %c0_i32_1 = arith.constant 0 : i32
    return %c0_i32, %c0_i32_0 : i32, i32
  }
  func.func @transform_6(%arg0: i32, %arg1: i32, %arg2: i32) -> (i32, i32) {
    %c0_i32 = arith.constant 0 : i32
    %c0_i32_0 = arith.constant 0 : i32
    %c0_i32_1 = arith.constant 0 : i32
    return %c0_i32, %c0_i32_0 : i32, i32
  }
  func.func @transform_7(%arg0: i32, %arg1: i32, %arg2: i32) -> (i32, i32) {
    %c0_i32 = arith.constant 0 : i32
    %c0_i32_0 = arith.constant 0 : i32
    %c0_i32_1 = arith.constant 0 : i32
    return %c0_i32, %c0_i32_0 : i32, i32
  }
  func.func @transform_8(%arg0: i32, %arg1: i32, %arg2: i32) -> (i32, i32) {
    %c0_i32 = arith.constant 0 : i32
    %c0_i32_0 = arith.constant 0 : i32
    %c0_i32_1 = arith.constant 0 : i32
    return %c0_i32, %c0_i32_0 : i32, i32
  }
  func.func @transform_9(%arg0: i32, %arg1: i32, %arg2: i32) -> (i32, i32) {
    %c0_i32 = arith.constant 0 : i32
    %c0_i32_0 = arith.constant 0 : i32
    %c0_i32_1 = arith.constant 0 : i32
    return %c0_i32, %c0_i32_0 : i32, i32
  }
  func.func @transform_10(%arg0: i32, %arg1: i32, %arg2: i32) -> (i32, i32) {
    %c0_i32 = arith.constant 0 : i32
    %c0_i32_0 = arith.constant 0 : i32
    %c0_i32_1 = arith.constant 0 : i32
    return %c0_i32, %c0_i32_0 : i32, i32
  }
  func.func @transform_11(%arg0: i32, %arg1: i32, %arg2: i32) -> (i32, i32) {
    %c0_i32 = arith.constant 0 : i32
    %c0_i32_0 = arith.constant 0 : i32
    %c0_i32_1 = arith.constant 0 : i32
    return %c0_i32, %c0_i32_0 : i32, i32
  }
  func.func @transform_12(%arg0: i32, %arg1: i32, %arg2: i32) -> (i32, i32) {
    %c0_i32 = arith.constant 0 : i32
    %c0_i32_0 = arith.constant 0 : i32
    %c0_i32_1 = arith.constant 0 : i32
    return %c0_i32, %c0_i32_0 : i32, i32
  }
}

</mosaic_0001>

<bundles_post_ra>
// kernel: tpu_custom_call.1
= control target key start
LH: loop header
LB: loop body
LE: loop exit
PB: predicated region body
PF: predicated region fallthrough
CT: control target
= control target key end

     0   :  { %s4411_s0 = inlined_call_operand.hbm [shape: bf16[256,256], index: 0, kind: input, shape index: {}]   ;;  %s4412_s1 = inlined_call_operand.hbm [shape: bf16[256,128], index: 1, kind: input, shape index: {}]   ;;  %s4413_s2 = inlined_call_operand.hbm [shape: bf16[128,128], index: 2, kind: input, shape index: {}]   ;;  %s4414_s3 = inlined_call_operand.hbm [shape: f32[1,128], index: 3, kind: input, shape index: {}]   ;;  %s4415_s4 = inlined_call_operand.hbm [shape: bf16[128,128], index: 4, kind: input, shape index: {}]   ;;  %s4416_s5 = inlined_call_operand.hbm [shape: f32[1,128], index: 5, kind: input, shape index: {}]   ;;  %s4417_s6 = inlined_call_operand.hbm [shape: bf16[128,256], index: 6, kind: input, shape index: {}]   ;;  %s4418_s7 = inlined_call_operand.vmem [shape: f32[1,256], index: 7, kind: input, shape index: {}]   ;;  %s4419_s8 = inlined_call_operand.hbm [shape: bf16[256,256], index: 8, kind: input, shape index: {}]   ;;  %s4420_s9 = inlined_call_operand.vmem [shape: f32[1,256], index: 9, kind: input, shape index: {}]   ;;  %s4421_s10 = inlined_call_operand.hbm [shape: bf16[256,128], index: 10, kind: input, shape index: {}]   ;;  %s4422_s11 = inlined_call_operand.vmem [shape: f32[1,128], index: 11, kind: input, shape index: {}]   ;;  %s4423_s12 = inlined_call_operand.hbm [shape: f32[256,128], index: 12, kind: output, shape index: {}]  }
   0x1   :  { %4432 = sst [smem:[#allocation31_spill]] %s4412_s1 }
   0x2   :  { %4433 = sst [smem:[#allocation32_spill]] %s4413_s2 }
   0x3   :  { %4434 = sst [smem:[#allocation33_spill]] %s4414_s3 }
   0x4   :  { %4435 = sst [smem:[#allocation34_spill]] %s4415_s4 }
   0x5   :  { %4436 = sst [smem:[#allocation35_spill]] %s4416_s5 }
   0x6   :  { %4437 = sst [smem:[#allocation36_spill]] %s4417_s6 }
   0x7   :  { %4438 = sst [smem:[#allocation37_spill]] %s4418_s7 }
   0x8   :  { %4439 = sst [smem:[#allocation38_spill]] %s4419_s8 }
   0x9   :  { %4440 = sst [smem:[#allocation39_spill]] %s4420_s9 }
   0xa   :  { %4441 = sst [smem:[#allocation40_spill]] %s4422_s11 }
   0xb   :  { %4442 = sst [smem:[#allocation41_spill]] %s4423_s12 }
   0xc   :  { %17 = vsyncpa [#allocation6], 0 }
   0xd   :  { %19 = vsyncpa [#allocation6 + $0x1], 0 }
   0xe   :  { %20 = vsyncpa [#allocation9], 0 }
   0xf   :  { %21 = vsyncpa [#allocation12], 0 }
  0x10   :  { %22 = vsyncpa [#allocation15], 0 }
  0x11   :  { %23 = vsyncpa [#allocation18], 0 }
  0x12   :  { %24 = vsyncpa [#allocation7], 0  ;;  %s3773_s21 = smov 0   ;;  %s3775_s22 = smov 0  }
  0x13   :  { %s3777_s23 = smov 0   ;;  %s3779_s24 = smov 0  }
  0x14   :  { %s3781_s25 = smov 0   ;;  %s3783_s26 = smov 0  }
  0x15   :  { %s3785_s27 = smov 0   ;;  %s3787_s28 = smov 0  }
  0x16   :  { %s3789_s29 = smov 0   ;;  %s3791_s30 = smov 0  }
  0x17 LB: > { %4443 = sst [smem:[#allocation27_spill]] %s3665_s24  ;;  %s4424_s13 = sadd.s32 4294967295, %s3689_s30   ;;  %s3689_s30 = sphi %s3791_s30, %s30_s30   ;;  %s3685_s29 = sphi %s3789_s29, %s4491_s29   ;;  %s3681_s28 = sphi %s3787_s28, %s4490_s28   ;;  %s3677_s27 = sphi %s3785_s27, %s4489_s27   ;;  %s3673_s26 = sphi %s3783_s26, %s4488_s26   ;;  %s3669_s25 = sphi %s3781_s25, %s4487_s25   ;;  %s3665_s24 = sphi %s3779_s24, %s4486_s24   ;;  %s3661_s23 = sphi %s3777_s23, %s4485_s23   ;;  %s3657_s22 = sphi %s3775_s22, %s4484_s22   ;;  %s3653_s21 = sphi %s3773_s21, %s4483_s21  }
  0x18   : > { %4444 = sst [smem:[#allocation28_spill]] %s3669_s25  ;;  %p2456_p0 = scmp.ge.s32.totalorder %s3689_s30, 1 }
  0x19   : > { %4445 = sst [smem:[#allocation29_spill]] %s3673_s26  ;;  %p3827_p1 = scmp.eq.s32.totalorder %s4424_s13, 0 }
  0x1a   : > { %p334_p2 = scmp.lt.s32.totalorder %s3689_s30, 13  ;;  %s4447_s1 = sld [smem:[#allocation31_spill]] }
  0x1b   : > { %s3691_s19 = smov [#allocation8]   ;;  %s4451_s3 = sld [smem:[#allocation33_spill]] }
  0x1c   : > { %p3835_p3 = pnand %p2456_p0, %p334_p2  ;;  %s347_s20 = sshll.u32 %s3691_s19, 4  ;;  %s348_s20 = int_to_ptr.vmem [resolvable:$true] %s347_s20 }
  0x1d   : > { %s4430_s16 = smov 64   ;;  %s3694_s19 = smov [#allocation11]  }
  0x1e   : > { %s4448_s18 = scalar_select %p3835_p3, 1, 0 }
  0x1f   : > { %p3141_p4 = pneg %p3835_p3  ;;  %s376_s9 = sshll.u32 %s3694_s19, 4  ;;  %s377_s9 = int_to_ptr.vmem [resolvable:$true] %s376_s9 }
  0x20   : > { %s345_s17 = sshll.u32 %s4447_s1, 4  ;;  %4449 = sst [smem:[#allocation30_spill]] %s4448_s18  ;;  %s346_s17 = int_to_ptr.hbm [resolvable:$true] %s345_s17 }
  0x21   : > { %p3843_p5 = pnand %p3141_p4, %p3827_p1  ;;  %s374_s15 = sshll.u32 %s4451_s3, 4  ;;  %s375_s15 = int_to_ptr.hbm [resolvable:$true] %s374_s15 }
  0x22   : > { %s4431_s1 = smov 4   ;;  %s4452_s5 = sld [smem:[#allocation35_spill]] }
  0x23   : > { %3144 = dma.hbm_to_vmem [thread:$0]  (!%p3843_p5), %s346_s17, 2048, %s348_s20, [#allocation9], %s4430_s16, %s4430_s16, %s4431_s1  }
  0x24   : > { %3150 = dma.hbm_to_vmem [thread:$0]  (!%p3843_p5), %s375_s15, 16, %s377_s9, [#allocation12]  }
  0x25   : > { %s3695_s11 = smov [#allocation14]   ;;  %s4453_s8 = sld [smem:[#allocation38_spill]] }
  0x26   : > { %s402_s12 = sshll.u32 %s3695_s11, 4  ;;  %s3696_s17 = smov [#allocation17]   ;;  %s403_s12 = int_to_ptr.vmem [resolvable:$true] %s402_s12 }
  0x27   : > { %s430_s20 = sshll.u32 %s3696_s17, 4  ;;  %s4454_s2 = sld [smem:[#allocation32_spill]]  ;;  %s431_s20 = int_to_ptr.vmem [resolvable:$true] %s430_s20 }
  0x28   : > { %s400_s25 = sshll.u32 %s4452_s5, 4  ;;  %s4429_s9 = smov 128   ;;  %s401_s25 = int_to_ptr.hbm [resolvable:$true] %s400_s25 }
  0x29   : > { %3156 = dma.hbm_to_vmem [thread:$0]  (!%p3843_p5), %s401_s25, 16, %s403_s12, [#allocation15]  }
  0x2a   : > { %s3698_s15 = smov 8   ;;  %s4455_s4 = sld [smem:[#allocation34_spill]] }
  0x2b   : > { %s428_s18 = sshll.u32 %s4453_s8, 4  ;;  %s3699_s11 = smov [#allocation10]   ;;  %s429_s18 = int_to_ptr.hbm [resolvable:$true] %s428_s18 }
  0x2c   : > { %3162 = dma.hbm_to_vmem [thread:$0]  (!%p3843_p5), %s429_s18, 4096, %s431_s20, [#allocation18], %s4429_s9, %s4429_s9, %s3698_s15  }
  0x2d   : > { %s359_s19 = sshll.u32 %s4454_s2, 4  ;;  %s361_s12 = sshll.u32 %s3699_s11, 4  ;;  %s360_s19 = int_to_ptr.hbm [resolvable:$true] %s359_s19  ;;  %s362_s12 = int_to_ptr.vmem [resolvable:$true] %s361_s12 }
  0x2e   : > { %3147 = dma.hbm_to_vmem [thread:$0]  (!%p3843_p5), %s360_s19, 1024, %s362_s12, [#allocation9], %s4430_s16, %s4430_s16, %s4431_s1  }
  0x2f   : > { %s3700_s17 = smov [#allocation13]   ;;  %s4456_s6 = sld [smem:[#allocation36_spill]] }
  0x30   : > { %s385_s25 = sshll.u32 %s4455_s4, 4  ;;  %s387_s7 = sshll.u32 %s3700_s17, 4  ;;  %s386_s25 = int_to_ptr.hbm [resolvable:$true] %s385_s25  ;;  %s388_s7 = int_to_ptr.vmem [resolvable:$true] %s387_s7 }
  0x31   : > { %3153 = dma.hbm_to_vmem [thread:$0]  (!%p3843_p5), %s386_s25, 1024, %s388_s7, [#allocation12], %s4430_s16, %s4430_s16, %s4431_s1  }
  0x32   : > { %s445_s26 = sshll.u32 %s4421_s10, 4  ;;  %s3701_s11 = smov [#allocation16]   ;;  %s446_s26 = int_to_ptr.hbm [resolvable:$true] %s445_s26 }
  0x33   : > { %s413_s12 = sshll.u32 %s3701_s11, 4  ;;  %s3702_s25 = smov [#allocation19]   ;;  %s414_s12 = int_to_ptr.vmem [resolvable:$true] %s413_s12 }
  0x34   : > { %s447_s17 = sshll.u32 %s3702_s25, 4  ;;  %s42_s7 = sadd.s32 1, %s3677_s27  ;;  %s448_s17 = int_to_ptr.vmem [resolvable:$true] %s447_s17 }
  0x35   : > { %s411_s20 = sshll.u32 %s4456_s6, 4  ;;  %s45_s24 = sadd.s32 1, %s3681_s28  ;;  %s412_s20 = int_to_ptr.hbm [resolvable:$true] %s411_s20 }
  0x36   : > { %3159 = dma.hbm_to_vmem [thread:$0]  (!%p3843_p5), %s412_s20, 2048, %s414_s12, [#allocation15], %s4429_s9, %s4429_s9, %s3698_s15  }
  0x37   : > { %3165 = dma.hbm_to_vmem [thread:$0]  (!%p3843_p5), %s446_s26, 2048, %s448_s17, [#allocation18], %s4430_s16, %s4430_s16, %s4431_s1  }
  0x38   : > { %p43_p6 = scmp.ge.s32.totalorder %s42_s7, 2  ;;  %s49_s18 = sadd.s32 1, %s3685_s29 }
  0x39   : > { %s58_s3 = sadd.s32 1, %s3661_s23  ;;  %p65_p7 = scmp.ne.s32.totalorder %s3661_s23, %s3657_s22 }
  0x3a   : > { %s4493_s7 = smov (%p43_p6, %s42_s7), 0  ;;  %s4495_s24 = smov (!%p43_p6, %s45_s24), %s3681_s28 }
  0x3b   : > { %s54_s13 = ssub.s32 %s3677_s27, %s4493_s7  ;;  %p66_p8 = scmp.eq.s32.totalorder %s3689_s30, 0 }
  0x3c   : > { %p47_p9 = scmp.ge.s32.totalorder %s4495_s24, 2  ;;  %p71_p10 = scmp.ne.s32.totalorder %s3657_s22, %s3653_s21 }
  0x3d   : > { %p3914_p11 = por %p66_p8, %p65_p7  ;;  %p3178_p12 = scmp.lt.s32.totalorder %s3689_s30, 12 }
  0x3e   : > { %s4497_s24 = smov (%p47_p9, %s4495_s24), 0  ;;  %s4499_s18 = smov (!%p47_p9, %s49_s18), %s3685_s29 }
  0x3f   : > { %s53_s20 = ssub.s32 %s3681_s28, %s4497_s24  ;;  %p3926_p13 = por %p3827_p1, %p71_p10 }
  0x40   : > { %p51_p0 = scmp.ge.s32.totalorder %s4499_s18, 3  ;;  %s55_s26 = sor.u32 %s54_s13, %s53_s20 }
  0x41   : > { %p56_p2 = scmp.eq.s32.totalorder %s55_s26, 0  ;;  %s464_s21 = sand.u32 1, %s3661_s23  }
  0x42   : > { %s4501_s18 = smov (%p51_p0, %s4499_s18), 0  ;;  %s2466_s12 = sshll.u32 %s464_s21, 6 }
  0x43   : > { %s3934_s11 = scalar_select %p56_p2, %s3661_s23, %s58_s3  }
  0x44   : > { %s2848_s25 = sshll.u32 %s3681_s28, 5  ;;  %s468_s9 = scalar_lea.vmem [#allocation5], %s2466_s12 }
  0x45   : > { %s473_s17 = sadd.s32 %s3677_s27, %s2848_s25  ;;  %s478_s16 = sshll.u32 %s468_s9, 4  ;;  %s479_s16 = int_to_ptr.vmem [resolvable:$true] %s478_s16 }
  0x46   : > { %s2469_s1 = sshll.u32 %s473_s17, 2  ;;  %p3167_p4 = pnand %p3178_p12, %p3914_p11 }
  0x47   : > { %s475_s5 = scalar_lea.hbm %s4411_s0, %s2469_s1  ;;  %s465_s20 = scalar_lea.sflag [#allocation6], %s464_s21 }
  0x48   : > { %s476_s13 = sshll.u32 %s475_s5, 4  ;;  %s4459_s26 = smov 4   ;;  %s477_s13 = int_to_ptr.hbm [resolvable:$true] %s476_s13 }
  0x49   : > { %s4460_s3 = smov 64   ;;  %s4461_s6 = smov 128  }
  0x4a   : > { %3169 = dma.hbm_to_vmem [thread:$0]  (!%p3167_p4), %s477_s13, 1024, %s479_s16, %s465_s20, %s4461_s6, %s4460_s3, %s4459_s26  }
  0x4b   : > { %490 = sbr.rel (%p3835_p3) target bundleno = 1434 (0x59a), region = 68  ;;  %s492_s9 = sand.u32 (!%p3835_p3), 1, %s3657_s22  }
  0x4c   : > { %s2471_s12 = sshll.u32 (!%p3835_p3), %s492_s9, 6  ;;  %s493_s25 = scalar_lea.sflag (!%p3835_p3), [#allocation6], %s492_s9 }
  0x4d   : > { %s3951_s2 = scalar_lea.vmem (!%p3835_p3), [#allocation5], %s2471_s12 }
  0x50   : > { %3628 = dma.done.wait (%p3926_p13), %s493_s25, 1024  }
  0x51   : > { %3630 = vsyncadd (%p3926_p13), %s493_s25, 4294966272 }
  0x52   : > { %3632 = dma.done.wait (%p3827_p1), [#allocation9], 3072  }
  0x53   : > { %3634 = vsyncadd (%p3827_p1), [#allocation9], 4294964224 }
  0x54   : > { %3636 = dma.done.wait (%p3827_p1), [#allocation12], 1040  }
  0x55   : > { %3638 = vsyncadd (%p3827_p1), [#allocation12], 4294966256 }
  0x56   : > { %3640 = dma.done.wait (%p3827_p1), [#allocation15], 2064  }
  0x57   : > { %3642 = vsyncadd (%p3827_p1), [#allocation15], 4294965232 }
  0x58   : > { %3644 = dma.done.wait (%p3827_p1), [#allocation18], 6144  }
  0x59   : > { %3646 = vsyncadd (%p3827_p1), [#allocation18], 4294961152  ;;  %s4463_s1 = sld [smem:[#allocation29_spill]] }
  0x5a   : > { %s4464_s4 = sld [smem:[#allocation28_spill]] }
  0x5b   : > { %s4465_s5 = sld [smem:[#allocation27_spill]] }
  0x5f   : > { %p575_p3 = scmp.eq.s32.totalorder %s4463_s1, 0 }
  0x60   : > { %p576_p5 = scmp.eq.s32.totalorder %s4464_s4, 0 }
  0x61   : > { %p579_p7 = scmp.eq.s32.totalorder %s4465_s5, 0 }
  0x62   : > { %p577_p6 = pnand %p576_p5, %p575_p3 }
  0x64   : > { %p578_p8 = pneg %p577_p6 }
  0x66   : > { %p580_p9 = pnand %p579_p7, %p578_p8 }
  0x68   : > { %583 = sbr.rel (%p580_p9) target bundleno = 174 (0xae), region = 108 }
  0x6d   : > { %v3703_v0 = vmov 0  }
  0x6e   : > { %584 = vst [vmem:[#allocation2] sm:$0xf] %v3703_v0 }
  0x6f   : > { %585 = vst [vmem:[#allocation2 + $0x4] sm:$0xf] %v3703_v0 }
  0x70   : > { %586 = vst [vmem:[#allocation2 + $0x8] sm:$0xf] %v3703_v0 }
  0x71   : > { %587 = vst [vmem:[#allocation2 + $0xc] sm:$0xf] %v3703_v0 }
  0x72   : > { %588 = vst [vmem:[#allocation2 + $0x10] sm:$0xf] %v3703_v0 }
  0x73   : > { %589 = vst [vmem:[#allocation2 + $0x14] sm:$0xf] %v3703_v0 }
  0x74   : > { %590 = vst [vmem:[#allocation2 + $0x18] sm:$0xf] %v3703_v0 }
  0x75   : > { %591 = vst [vmem:[#allocation2 + $0x1c] sm:$0xf] %v3703_v0 }
  0x76   : > { %592 = vst [vmem:[#allocation2 + $0x20] sm:$0xf] %v3703_v0 }
  0x77   : > { %593 = vst [vmem:[#allocation2 + $0x24] sm:$0xf] %v3703_v0 }
  0x78   : > { %594 = vst [vmem:[#allocation2 + $0x28] sm:$0xf] %v3703_v0 }
  0x79   : > { %595 = vst [vmem:[#allocation2 + $0x2c] sm:$0xf] %v3703_v0 }
  0x7a   : > { %596 = vst [vmem:[#allocation2 + $0x30] sm:$0xf] %v3703_v0 }
  0x7b   : > { %597 = vst [vmem:[#allocation2 + $0x34] sm:$0xf] %v3703_v0 }
  0x7c   : > { %598 = vst [vmem:[#allocation2 + $0x38] sm:$0xf] %v3703_v0 }
  0x7d   : > { %599 = vst [vmem:[#allocation2 + $0x3c] sm:$0xf] %v3703_v0 }
  0x7e   : > { %600 = vst [vmem:[#allocation2 + $0x40] sm:$0xf] %v3703_v0 }
  0x7f   : > { %601 = vst [vmem:[#allocation2 + $0x44] sm:$0xf] %v3703_v0 }
  0x80   : > { %602 = vst [vmem:[#allocation2 + $0x48] sm:$0xf] %v3703_v0 }
  0x81   : > { %603 = vst [vmem:[#allocation2 + $0x4c] sm:$0xf] %v3703_v0 }
  0x82   : > { %604 = vst [vmem:[#allocation2 + $0x50] sm:$0xf] %v3703_v0 }
  0x83   : > { %605 = vst [vmem:[#allocation2 + $0x54] sm:$0xf] %v3703_v0 }
  0x84   : > { %606 = vst [vmem:[#allocation2 + $0x58] sm:$0xf] %v3703_v0 }
  0x85   : > { %607 = vst [vmem:[#allocation2 + $0x5c] sm:$0xf] %v3703_v0 }
  0x86   : > { %608 = vst [vmem:[#allocation2 + $0x60] sm:$0xf] %v3703_v0 }
  0x87   : > { %609 = vst [vmem:[#allocation2 + $0x64] sm:$0xf] %v3703_v0 }
  0x88   : > { %610 = vst [vmem:[#allocation2 + $0x68] sm:$0xf] %v3703_v0 }
  0x89   : > { %611 = vst [vmem:[#allocation2 + $0x6c] sm:$0xf] %v3703_v0 }
  0x8a   : > { %612 = vst [vmem:[#allocation2 + $0x70] sm:$0xf] %v3703_v0 }
  0x8b   : > { %613 = vst [vmem:[#allocation2 + $0x74] sm:$0xf] %v3703_v0 }
  0x8c   : > { %614 = vst [vmem:[#allocation2 + $0x78] sm:$0xf] %v3703_v0 }
  0x8d   : > { %615 = vst [vmem:[#allocation2 + $0x7c] sm:$0xf] %v3703_v0 }
  0x8e   : > { %616 = vst [vmem:[#allocation3] sm:$0xf] %v3703_v0 }
  0x8f   : > { %617 = vst [vmem:[#allocation3 + $0x4] sm:$0xf] %v3703_v0 }
  0x90   : > { %618 = vst [vmem:[#allocation3 + $0x8] sm:$0xf] %v3703_v0 }
  0x91   : > { %619 = vst [vmem:[#allocation3 + $0xc] sm:$0xf] %v3703_v0 }
  0x92   : > { %620 = vst [vmem:[#allocation3 + $0x10] sm:$0xf] %v3703_v0 }
  0x93   : > { %621 = vst [vmem:[#allocation3 + $0x14] sm:$0xf] %v3703_v0 }
  0x94   : > { %622 = vst [vmem:[#allocation3 + $0x18] sm:$0xf] %v3703_v0 }
  0x95   : > { %623 = vst [vmem:[#allocation3 + $0x1c] sm:$0xf] %v3703_v0 }
  0x96   : > { %624 = vst [vmem:[#allocation3 + $0x20] sm:$0xf] %v3703_v0 }
  0x97   : > { %625 = vst [vmem:[#allocation3 + $0x24] sm:$0xf] %v3703_v0 }
  0x98   : > { %626 = vst [vmem:[#allocation3 + $0x28] sm:$0xf] %v3703_v0 }
  0x99   : > { %627 = vst [vmem:[#allocation3 + $0x2c] sm:$0xf] %v3703_v0 }
  0x9a   : > { %628 = vst [vmem:[#allocation3 + $0x30] sm:$0xf] %v3703_v0 }
  0x9b   : > { %629 = vst [vmem:[#allocation3 + $0x34] sm:$0xf] %v3703_v0 }
  0x9c   : > { %630 = vst [vmem:[#allocation3 + $0x38] sm:$0xf] %v3703_v0 }
  0x9d   : > { %631 = vst [vmem:[#allocation3 + $0x3c] sm:$0xf] %v3703_v0 }
  0x9e   : > { %632 = vst [vmem:[#allocation3 + $0x40] sm:$0xf] %v3703_v0 }
  0x9f   : > { %633 = vst [vmem:[#allocation3 + $0x44] sm:$0xf] %v3703_v0 }
  0xa0   : > { %634 = vst [vmem:[#allocation3 + $0x48] sm:$0xf] %v3703_v0 }
  0xa1   : > { %635 = vst [vmem:[#allocation3 + $0x4c] sm:$0xf] %v3703_v0 }
  0xa2   : > { %636 = vst [vmem:[#allocation3 + $0x50] sm:$0xf] %v3703_v0 }
  0xa3   : > { %637 = vst [vmem:[#allocation3 + $0x54] sm:$0xf] %v3703_v0 }
  0xa4   : > { %638 = vst [vmem:[#allocation3 + $0x58] sm:$0xf] %v3703_v0 }
  0xa5   : > { %639 = vst [vmem:[#allocation3 + $0x5c] sm:$0xf] %v3703_v0 }
  0xa6   : > { %640 = vst [vmem:[#allocation3 + $0x60] sm:$0xf] %v3703_v0 }
  0xa7   : > { %641 = vst [vmem:[#allocation3 + $0x64] sm:$0xf] %v3703_v0 }
  0xa8   : > { %642 = vst [vmem:[#allocation3 + $0x68] sm:$0xf] %v3703_v0 }
  0xa9   : > { %643 = vst [vmem:[#allocation3 + $0x6c] sm:$0xf] %v3703_v0 }
  0xaa   : > { %644 = vst [vmem:[#allocation3 + $0x70] sm:$0xf] %v3703_v0 }
  0xab   : > { %645 = vst [vmem:[#allocation3 + $0x74] sm:$0xf] %v3703_v0 }
  0xac   : > { %646 = vst [vmem:[#allocation3 + $0x78] sm:$0xf] %v3703_v0 }
  0xad   : > { %647 = vst [vmem:[#allocation3 + $0x7c] sm:$0xf] %v3703_v0 }
  0xae PF: > { %s4466_s6 = sld [smem:[#allocation27_spill]] }
  0xb4   : > { %p2480_p1 = scmp.ne.s32.totalorder %s4466_s6, 0 }
  0xb6   : > { %650 = sbr.rel (%p2480_p1) target bundleno = 204 (0xcc), region = 112 }
  0xbb   : > { %v3704_v1 = vmov 0.0  }
  0xbc   : > { %651 = vst [vmem:[#allocation4 + $0x30] sm:$0xff] %v3704_v1 }
  0xbd   : > { %652 = vst [vmem:[#allocation4] sm:$0xff] %v3704_v1 }
  0xbe   : > { %653 = vst [vmem:[#allocation4 + $0x58] sm:$0xff] %v3704_v1 }
  0xbf   : > { %654 = vst [vmem:[#allocation4 + $0x18] sm:$0xff] %v3704_v1 }
  0xc0   : > { %655 = vst [vmem:[#allocation4 + $0x50] sm:$0xff] %v3704_v1 }
  0xc1   : > { %656 = vst [vmem:[#allocation4 + $0x68] sm:$0xff] %v3704_v1 }
  0xc2   : > { %657 = vst [vmem:[#allocation4 + $0x8] sm:$0xff] %v3704_v1 }
  0xc3   : > { %658 = vst [vmem:[#allocation4 + $0x48] sm:$0xff] %v3704_v1 }
  0xc4   : > { %659 = vst [vmem:[#allocation4 + $0x40] sm:$0xff] %v3704_v1 }
  0xc5   : > { %660 = vst [vmem:[#allocation4 + $0x20] sm:$0xff] %v3704_v1 }
  0xc6   : > { %661 = vst [vmem:[#allocation4 + $0x10] sm:$0xff] %v3704_v1 }
  0xc7   : > { %662 = vst [vmem:[#allocation4 + $0x38] sm:$0xff] %v3704_v1 }
  0xc8   : > { %663 = vst [vmem:[#allocation4 + $0x60] sm:$0xff] %v3704_v1 }
  0xc9   : > { %664 = vst [vmem:[#allocation4 + $0x70] sm:$0xff] %v3704_v1 }
  0xca   : > { %665 = vst [vmem:[#allocation4 + $0x78] sm:$0xff] %v3704_v1 }
  0xcb   : > { %666 = vst [vmem:[#allocation4 + $0x28] sm:$0xff] %v3704_v1 }
  0xcc PF: > { %s4467_s8 = sld [smem:[#allocation27_spill]]  ;;  %v2849_v20 = vld [vmem:[%s3951_s2] sm:$0xff] }
  0xcd   : > { %s4468_s14 = sld [smem:[#allocation29_spill]] }
  0xce   : > { %s744_s26 = scalar_select %p575_p3, 1, 0 }
  0xd0   : > { %v745_v15 = vstv %s744_s26 }
  0xd1   : > { %vm4074_vm1 = vcmp.eq.s32.totalorder %v745_v15, 1 }
  0xd2   : > { %s2481_s16 = sshll.u32 %s4467_s8, 7  ;;  %p2517_p11 = scmp.ne.s32.totalorder %s4467_s8, 1 }
  0xd3   : > { %s668_s15 = sshra.s32 %s2481_s16, 3  ;;  %p724_p10 = scmp.eq.s32.totalorder %s4468_s14, 1 }
  0xd4   : > { %s2482_s19 = sshll.u32 %s668_s15, 2  ;;  %s4473_s3 = sld [smem:[#allocation28_spill]] (!%p2517_p11) }
  0xd5   : > { %s4045_s21 = scalar_lea.vmem [#allocation2], %s2482_s19  ;;  %s4049_s17 = scalar_lea.vmem [#allocation8], %s2482_s19 }
  0xd6   : > { %v704_v2 = vld [vmem:[%s4045_s21 + $0x38] sm:$0xf]  ;;  %v705_v3 = vld [vmem:[%s4045_s21 + $0x3c] sm:$0xf]  ;;  %s4053_s13 = scalar_lea.vmem [#allocation3], %s2482_s19  ;;  %s4474_s12 = sld [smem:[#allocation29_spill]] (!%p2517_p11) }
  0xd7   : > { %v686_v4 = vld [vmem:[%s4049_s17 + $0x38] sm:$0xf]  ;;  %v687_v5 = vld [vmem:[%s4049_s17 + $0x3c] sm:$0xf]  ;;  %s725_s20 = scalar_select %p724_p10, 1, 0 }
  0xd8   : > { %v722_v6 = vld [vmem:[%s4053_s13 + $0x38] sm:$0xf]  ;;  %v684_v7 = vld [vmem:[%s4049_s17 + $0x30] sm:$0xf]  ;;  %v723_v8 = vld [vmem:[%s4053_s13 + $0x3c] sm:$0xf] }
  0xd9   : > { %v702_v9 = vld [vmem:[%s4045_s21 + $0x30] sm:$0xf]  ;;  %v726_v10 = vstv %s725_s20  ;;  %v703_v11 = vld [vmem:[%s4045_s21 + $0x34] sm:$0xf]  ;;  %v682_v17 = vld [vmem:[%s4049_s17 + $0x28] sm:$0xf] }
  0xda   : > { %v720_v12 = vld [vmem:[%s4053_s13 + $0x30] sm:$0xf]  ;;  %v721_v13 = vld [vmem:[%s4053_s13 + $0x34] sm:$0xf]  ;;  %vm4064_vm0 = vcmp.eq.s32.totalorder %v726_v10, 1  ;;  %s4183_s9 = sshll.u32 (!%p2517_p11), %s4473_s3, 7 }
  0xdb   : > { %v685_v16 = vld [vmem:[%s4049_s17 + $0x34] sm:$0xf]  ;;  %v742_v18 = vsel %vm4064_vm0, %v704_v2, %v722_v6  ;;  %v743_v19 = vsel %vm4064_vm0, %v705_v3, %v723_v8  ;;  %v740_v21 = vsel %vm4064_vm0, %v702_v9, %v720_v12  ;;  %v700_v22 = vld [vmem:[%s4045_s21 + $0x28] sm:$0xf]  ;;  %v701_v23 = vld [vmem:[%s4045_s21 + $0x2c] sm:$0xf]  ;;  %v741_v26 = vsel %vm4064_vm0, %v703_v11, %v721_v13 }
  0xdc   : > { %v761_v24 = vsel %vm4074_vm1, %v686_v4, %v742_v18  ;;  %v762_v25 = vsel %vm4074_vm1, %v687_v5, %v743_v19  ;;  %v759_v27 = vsel %vm4074_vm1, %v684_v7, %v740_v21  ;;  %v683_v28 = vld [vmem:[%s4049_s17 + $0x2c] sm:$0xf]  ;;  %v718_v29 = vld [vmem:[%s4053_s13 + $0x28] sm:$0xf]  ;;  %v760_v33 = vsel %vm4074_vm1, %v685_v16, %v741_v26  ;;  %v698_v35 = vld [vmem:[%s4045_s21 + $0x20] sm:$0xf] }
  0xdd   : > { %v719_v30 = vld [vmem:[%s4053_s13 + $0x2c] sm:$0xf]  ;;  %v873_v31 = vunpack.c.l.b16 %v761_v24  ;;  %v874_v32 = vunpack.c.l.b16 %v762_v25  ;;  %v871_v34 = vunpack.c.l.b16 %v759_v27  ;;  %v699_v36 = vld [vmem:[%s4045_s21 + $0x24] sm:$0xf]  ;;  %v872_v37 = vunpack.c.l.b16 %v760_v33  ;;  %v716_v40 = vld [vmem:[%s4053_s13 + $0x20] sm:$0xf] }
  0xde   : > { %v738_v38 = vsel %vm4064_vm0, %v700_v22, %v718_v29  ;;  %v739_v39 = vsel %vm4064_vm0, %v701_v23, %v719_v30  ;;  %v717_v41 = vld [vmem:[%s4053_s13 + $0x24] sm:$0xf]  ;;  %v680_v45 = vld [vmem:[%s4049_s17 + $0x20] sm:$0xf]  ;;  %v736_v47 = vsel %vm4064_vm0, %v698_v35, %v716_v40  ;;  %v696_v48 = vld [vmem:[%s4045_s21 + $0x18] sm:$0xf] }
  0xdf   : > { %v882_v42 = vpack.c.b16 %v874_v32, %v873_v31  ;;  %v757_v43 = vsel %vm4074_vm1, %v682_v17, %v738_v38  ;;  %v758_v44 = vsel %vm4074_vm1, %v683_v28, %v739_v39  ;;  %v681_v46 = vld [vmem:[%s4049_s17 + $0x24] sm:$0xf]  ;;  %v737_v49 = vsel %vm4064_vm0, %v699_v36, %v717_v41  ;;  %v697_v50 = vld [vmem:[%s4045_s21 + $0x1c] sm:$0xf]  ;;  %v714_v51 = vld [vmem:[%s4053_s13 + $0x18] sm:$0xf] }
  0xe0   : > { %v715_v52 = vld [vmem:[%s4053_s13 + $0x1c] sm:$0xf]  ;;  %v881_v53 = vpack.c.b16 %v872_v37, %v871_v34  ;;  %v869_v54 = vunpack.c.l.b16 %v757_v43  ;;  %v870_v55 = vunpack.c.l.b16 %v758_v44  ;;  %v755_v56 = vsel %vm4074_vm1, %v680_v45, %v736_v47  ;;  %v678_v58 = vld [vmem:[%s4049_s17 + $0x18] sm:$0xf]  ;;  %v694_v62 = vld [vmem:[%s4045_s21 + $0x10] sm:$0xf] }
  0xe1   : > { %891 = vmatpush.bf16.msra.mxu0 %v882_v42  ;;  %3031 = vmatpush.bf16.msra.mxu1 %v882_v42  ;;  %v756_v57 = vsel %vm4074_vm1, %v681_v46, %v737_v49  ;;  %v679_v59 = vld [vmem:[%s4049_s17 + $0x1c] sm:$0xf]  ;;  %v734_v60 = vsel %vm4064_vm0, %v696_v48, %v714_v51  ;;  %v735_v61 = vsel %vm4064_vm0, %v697_v50, %v715_v52  ;;  %v695_v63 = vld [vmem:[%s4045_s21 + $0x14] sm:$0xf]  ;;  %v712_v0 = vld [vmem:[%s4053_s13 + $0x10] sm:$0xf]  ;;  %v867_v3 = vunpack.c.l.b16 %v755_v56 }
  0xe2   : > { %3032 = vmatpush.bf16.msra.mxu2 %v882_v42  ;;  %3033 = vmatpush.bf16.msra.mxu3 %v882_v42  ;;  %v713_v1 = vld [vmem:[%s4053_s13 + $0x14] sm:$0xf]  ;;  %v880_v2 = vpack.c.b16 %v870_v55, %v869_v54  ;;  %v868_v4 = vunpack.c.l.b16 %v756_v57  ;;  %v753_v5 = vsel %vm4074_vm1, %v678_v58, %v734_v60  ;;  %v754_v6 = vsel %vm4074_vm1, %v679_v59, %v735_v61  ;;  %v676_v7 = vld [vmem:[%s4049_s17 + $0x10] sm:$0xf]  ;;  %v692_v11 = vld [vmem:[%s4045_s21 + $0x8] sm:$0xf] }
  0xe3   : > { %v677_v8 = vld [vmem:[%s4049_s17 + $0x14] sm:$0xf]  ;;  %v732_v9 = vsel %vm4064_vm0, %v694_v62, %v712_v0  ;;  %v733_v10 = vsel %vm4064_vm0, %v695_v63, %v713_v1  ;;  %v693_v12 = vld [vmem:[%s4045_s21 + $0xc] sm:$0xf]  ;;  %v710_v13 = vld [vmem:[%s4053_s13 + $0x8] sm:$0xf]  ;;  %v865_v17 = vunpack.c.l.b16 %v753_v5  ;;  %v866_v18 = vunpack.c.l.b16 %v754_v6 }
  0xe4   : > { %v711_v15 = vld [vmem:[%s4053_s13 + $0xc] sm:$0xf]  ;;  %v879_v16 = vpack.c.b16 %v868_v4, %v867_v3  ;;  %v751_v19 = vsel %vm4074_vm1, %v676_v7, %v732_v9  ;;  %v752_v21 = vsel %vm4074_vm1, %v677_v8, %v733_v10  ;;  %v674_v22 = vld [vmem:[%s4049_s17 + $0x8] sm:$0xf]  ;;  %v730_v24 = vsel %vm4064_vm0, %v692_v11, %v710_v13  ;;  %v690_v26 = vld [vmem:[%s4045_s21] sm:$0xf] }
  0xe5   : > { %892 = vmatpush.bf16.msra.mxu0 %v881_v53  ;;  %3034 = vmatpush.bf16.msra.mxu1 %v881_v53  ;;  %v675_v23 = vld [vmem:[%s4049_s17 + $0xc] sm:$0xf]  ;;  %v731_v25 = vsel %vm4064_vm0, %v693_v12, %v711_v15  ;;  %v691_v27 = vld [vmem:[%s4045_s21 + $0x4] sm:$0xf]  ;;  %v708_v28 = vld [vmem:[%s4053_s13] sm:$0xf]  ;;  %v878_v30 = vpack.c.b16 %v866_v18, %v865_v17  ;;  %v863_v31 = vunpack.c.l.b16 %v751_v19  ;;  %v864_v32 = vunpack.c.l.b16 %v752_v21 }
  0xe6   : > { %3035 = vmatpush.bf16.msra.mxu2 %v881_v53  ;;  %3036 = vmatpush.bf16.msra.mxu3 %v881_v53  ;;  %v709_v29 = vld [vmem:[%s4053_s13 + $0x4] sm:$0xf]  ;;  %v749_v33 = vsel %vm4074_vm1, %v674_v22, %v730_v24  ;;  %v750_v34 = vsel %vm4074_vm1, %v675_v23, %v731_v25  ;;  %v672_v35 = vld [vmem:[%s4049_s17] sm:$0xf]  ;;  %v728_v37 = vsel %vm4064_vm0, %v690_v26, %v708_v28  ;;  %v2851_v47 = vld [vmem:[%s3951_s2 + $0x10] sm:$0xff]  ;;  %p2519_p12 = scmp.ne.s32.totalorder (!%p2517_p11), %s4474_s12, 0 }
  0xe7   : > { %v673_v36 = vld [vmem:[%s4049_s17 + $0x4] sm:$0xf]  ;;  %v729_v38 = vsel %vm4064_vm0, %v691_v27, %v709_v29  ;;  %v877_v39 = vpack.c.b16 %v864_v32, %v863_v31  ;;  %v861_v40 = vunpack.c.l.b16 %v749_v33  ;;  %v862_v41 = vunpack.c.l.b16 %v750_v34  ;;  %v2855_v49 = vld [vmem:[%s3951_s2 + $0x30] sm:$0xff]  ;;  %v2850_v50 = vld [vmem:[%s3951_s2 + $0x8] sm:$0xff] }
  0xe8   : > { %v747_v42 = vsel %vm4074_vm1, %v672_v35, %v728_v37  ;;  %v748_v43 = vsel %vm4074_vm1, %v673_v36, %v729_v38  ;;  %v2853_v48 = vld [vmem:[%s3951_s2 + $0x20] sm:$0xff]  ;;  %v2852_v51 = vld [vmem:[%s3951_s2 + $0x18] sm:$0xff]  ;;  %v2854_v52 = vld [vmem:[%s3951_s2 + $0x28] sm:$0xff] }
  0xe9   : > { %893 = vmatpush.bf16.msra.mxu0 %v880_v2  ;;  %3037 = vmatpush.bf16.msra.mxu1 %v880_v2  ;;  %v876_v14 = vpack.c.b16 %v862_v41, %v861_v40  ;;  %v859_v44 = vunpack.c.l.b16 %v747_v42  ;;  %v860_v45 = vunpack.c.l.b16 %v748_v43  ;;  %v2856_v53 = vld [vmem:[%s3951_s2 + $0x38] sm:$0xff]  ;;  %v763_v54 = vld [vmem:[#allocation4 + $0x30] sm:$0xff]  ;;  %v771_v60 = vld [vmem:[#allocation4 + $0x40] sm:$0xff] }
  0xea   : > { %3038 = vmatpush.bf16.msra.mxu2 %v880_v2  ;;  %3039 = vmatpush.bf16.msra.mxu3 %v880_v2  ;;  %v767_v55 = vld [vmem:[#allocation4 + $0x50] sm:$0xff]  ;;  %v775_v61 = vld [vmem:[#allocation4 + $0x60] sm:$0xff]  ;;  %v768_v63 = vld [vmem:[#allocation4 + $0x68] sm:$0xff] }
  0xeb   : > { %v875_v46 = vpack.c.b16 %v860_v45, %v859_v44  ;;  %v764_v62 = vld [vmem:[#allocation4] sm:$0xff]  ;;  %v776_v9 = vld [vmem:[#allocation4 + $0x70] sm:$0xff]  ;;  %v765_v10 = vld [vmem:[#allocation4 + $0x58] sm:$0xff] }
  0xec   : > { %v772_v8 = vld [vmem:[#allocation4 + $0x20] sm:$0xff]  ;;  %v769_v11 = vld [vmem:[#allocation4 + $0x8] sm:$0xff]  ;;  %v773_v22 = vld [vmem:[#allocation4 + $0x10] sm:$0xff] }
  0xed   : > { %894 = vmatpush.bf16.msra.mxu0 %v879_v16  ;;  %3040 = vmatpush.bf16.msra.mxu1 %v879_v16  ;;  %v777_v23 = vld [vmem:[#allocation4 + $0x78] sm:$0xff]  ;;  %v770_v25 = vld [vmem:[#allocation4 + $0x48] sm:$0xff] }
  0xee   : > { %3041 = vmatpush.bf16.msra.mxu2 %v879_v16  ;;  %3042 = vmatpush.bf16.msra.mxu3 %v879_v16  ;;  %v766_v24 = vld [vmem:[#allocation4 + $0x18] sm:$0xff]  ;;  %v778_v35 = vld [vmem:[#allocation4 + $0x28] sm:$0xff] }
  0xef   : > { %v774_v34 = vld [vmem:[#allocation4 + $0x38] sm:$0xff] }
  0xf1   : > { %895 = vmatpush.bf16.msra.mxu0 %v878_v30  ;;  %3043 = vmatpush.bf16.msra.mxu1 %v878_v30 }
  0xf2   : > { %3044 = vmatpush.bf16.msra.mxu2 %v878_v30  ;;  %3045 = vmatpush.bf16.msra.mxu3 %v878_v30 }
  0xf5   : > { %896 = vmatpush.bf16.msra.mxu0 %v877_v39  ;;  %3046 = vmatpush.bf16.msra.mxu1 %v877_v39 }
  0xf6   : > { %3047 = vmatpush.bf16.msra.mxu2 %v877_v39  ;;  %3048 = vmatpush.bf16.msra.mxu3 %v877_v39 }
  0xf9   : > { %897 = vmatpush.bf16.msra.mxu0 %v876_v14  ;;  %3049 = vmatpush.bf16.msra.mxu1 %v876_v14 }
  0xfa   : > { %3050 = vmatpush.bf16.msra.mxu2 %v876_v14  ;;  %3051 = vmatpush.bf16.msra.mxu3 %v876_v14 }
  0xfd   : > { %898 = vmatpush.bf16.msra.mxu0 %v875_v46  ;;  %3052 = vmatpush.bf16.msra.mxu1 %v875_v46 }
  0xfe   : > { %3053 = vmatpush.bf16.msra.mxu2 %v875_v46  ;;  %3054 = vmatpush.bf16.msra.mxu3 %v875_v46 }
 0x100   : > { %899 = vmatmul.bf16.vlgmr.msra.gmra.mxu0 %v2849_v20  ;;  %909 = vmatmul.bf16.vlgmr.msra.gmra.mxu1 %v2851_v47 }
 0x101   : > { %919 = vmatmul.bf16.vlgmr.msra.gmra.mxu2 %v2853_v48  ;;  %929 = vmatmul.bf16.vlgmr.msra.gmra.mxu3 %v2855_v49 }
 0x110   : > { %904 = vmatmul.bf16.gmra.mxu0 %v2850_v50  ;;  %914 = vmatmul.bf16.gmra.mxu1 %v2852_v51 }
 0x111   : > { %924 = vmatmul.bf16.gmra.mxu2 %v2854_v52  ;;  %934 = vmatmul.bf16.gmra.mxu3 %v2856_v53 }
 0x17d   : > { %v900_v56 = vpop.f32.mrf.mxu0  ;;  %v910_v57 = vpop.f32.mrf.mxu1 }
 0x17e   : > { %v940_v58 = vadd.f32 %v900_v56, %v763_v54  ;;  %v944_v59 = vadd.f32 %v910_v57, %v767_v55 }
 0x180   : > { %956 = vst [vmem:[#allocation4 + $0x30] sm:$0xff] %v940_v58 }
 0x181   : > { %960 = vst [vmem:[#allocation4 + $0x50] sm:$0xff] %v944_v59 }
 0x184   : > { %v920_v0 = vpop.f32.mrf.mxu2  ;;  %v930_v1 = vpop.f32.mrf.mxu3 }
 0x185   : > { %v948_v2 = vadd.f32 %v920_v0, %v771_v60  ;;  %v952_v3 = vadd.f32 %v930_v1, %v775_v61  ;;  %v902_v4 = vpop.f32.mrf.mxu0  ;;  %v912_v5 = vpop.f32.mrf.mxu1 }
 0x186   : > { %v941_v6 = vadd.f32 %v902_v4, %v764_v62  ;;  %v945_v7 = vadd.f32 %v912_v5, %v768_v63 }
 0x187   : > { %964 = vst [vmem:[#allocation4 + $0x40] sm:$0xff] %v948_v2 }
 0x188   : > { %968 = vst [vmem:[#allocation4 + $0x60] sm:$0xff] %v952_v3 }
 0x189   : > { %957 = vst [vmem:[#allocation4] sm:$0xff] %v941_v6 }
 0x18a   : > { %961 = vst [vmem:[#allocation4 + $0x68] sm:$0xff] %v945_v7 }
 0x18c   : > { %v922_v12 = vpop.f32.mrf.mxu2  ;;  %v932_v13 = vpop.f32.mrf.mxu3 }
 0x18d   : > { %v949_v15 = vadd.f32 %v922_v12, %v772_v8  ;;  %v953_v16 = vadd.f32 %v932_v13, %v776_v9  ;;  %v905_v17 = vpop.f32.mrf.mxu0  ;;  %v915_v18 = vpop.f32.mrf.mxu1 }
 0x18e   : > { %v942_v19 = vadd.f32 %v905_v17, %v765_v10  ;;  %v946_v21 = vadd.f32 %v915_v18, %v769_v11 }
 0x18f   : > { %965 = vst [vmem:[#allocation4 + $0x20] sm:$0xff] %v949_v15 }
 0x190   : > { %969 = vst [vmem:[#allocation4 + $0x70] sm:$0xff] %v953_v16 }
 0x191   : > { %958 = vst [vmem:[#allocation4 + $0x58] sm:$0xff] %v942_v19 }
 0x192   : > { %962 = vst [vmem:[#allocation4 + $0x8] sm:$0xff] %v946_v21 }
 0x194   : > { %v925_v26 = vpop.f32.mrf.mxu2  ;;  %v935_v27 = vpop.f32.mrf.mxu3 }
 0x195   : > { %v950_v28 = vadd.f32 %v925_v26, %v773_v22  ;;  %v954_v29 = vadd.f32 %v935_v27, %v777_v23  ;;  %v907_v30 = vpop.f32.mrf.mxu0  ;;  %v917_v31 = vpop.f32.mrf.mxu1 }
 0x196   : > { %v943_v32 = vadd.f32 %v907_v30, %v766_v24  ;;  %v947_v33 = vadd.f32 %v917_v31, %v770_v25 }
 0x197   : > { %966 = vst [vmem:[#allocation4 + $0x10] sm:$0xff] %v950_v28 }
 0x198   : > { %970 = vst [vmem:[#allocation4 + $0x78] sm:$0xff] %v954_v29 }
 0x199   : > { %959 = vst [vmem:[#allocation4 + $0x18] sm:$0xff] %v943_v32 }
 0x19a   : > { %963 = vst [vmem:[#allocation4 + $0x48] sm:$0xff] %v947_v33 }
 0x19c   : > { %v927_v36 = vpop.f32.mrf.mxu2  ;;  %v937_v37 = vpop.f32.mrf.mxu3  ;;  %975 = sbr.rel (%p2517_p11) target bundleno = 1424 (0x590), region = 116 }
 0x19d   : > { %v951_v38 = vadd.f32 %v927_v36, %v774_v34  ;;  %v955_v39 = vadd.f32 %v937_v37, %v778_v35 }
 0x19f   : > { %967 = vst [vmem:[#allocation4 + $0x38] sm:$0xff] %v951_v38 }
 0x1a0   : > { %971 = vst [vmem:[#allocation4 + $0x28] sm:$0xff] %v955_v39 }
 0x1a1   : > { %v977_v40 = vld [vmem:[#allocation4 + $0x30] sm:$0xff]  ;;  %v978_v41 = vld [vmem:[#allocation4] sm:$0xff]  ;;  %v979_v42 = vld [vmem:[#allocation4 + $0x58] sm:$0xff]  ;;  %s1153_s25 = sshra.s32 (!%p2519_p12), %s4183_s9, 3 }
 0x1a2   : > { %v980_v43 = vld [vmem:[#allocation4 + $0x18] sm:$0xff]  ;;  %v981_v14 = vld [vmem:[#allocation4 + $0x50] sm:$0xff]  ;;  %v982_v44 = vld [vmem:[#allocation4 + $0x68] sm:$0xff]  ;;  %v4185_v45 = vpack.c.bf16 %v978_v41, %v977_v40  ;;  %s2552_s2 = sshll.u32 (!%p2519_p12), %s1153_s25, 2 }
 0x1a3   : > { %v983_v46 = vld [vmem:[#allocation4 + $0x8] sm:$0xff]  ;;  %v985_v47 = vld [vmem:[#allocation4 + $0x40] sm:$0xff]  ;;  %v4187_v48 = vpack.c.bf16 %v980_v43, %v979_v42  ;;  %v4189_v49 = vpack.c.bf16 %v982_v44, %v981_v14  ;;  %v987_v51 = vld [vmem:[#allocation4 + $0x10] sm:$0xff]  ;;  %s4211_s1 = scalar_lea.vmem (!%p2519_p12), [#allocation2], %s2552_s2 }
 0x1a4   : > { %v984_v20 = vld [vmem:[#allocation4 + $0x48] sm:$0xff]  ;;  %v986_v50 = vld [vmem:[#allocation4 + $0x20] sm:$0xff]  ;;  %v990_v55 = vld [vmem:[#allocation4 + $0x70] sm:$0xff]  ;;  %1003 = sbr.rel (%p2519_p12) target bundleno = 622 (0x26e), region = 120 }
 0x1a5   : > { %v4191_v53 = vpack.c.bf16 %v984_v20, %v983_v46  ;;  %v989_v54 = vld [vmem:[#allocation4 + $0x60] sm:$0xff]  ;;  %v991_v56 = vld [vmem:[#allocation4 + $0x78] sm:$0xff]  ;;  %v4193_v57 = vpack.c.bf16 %v986_v50, %v985_v47 }
 0x1a6   : > { %v988_v52 = vld [vmem:[#allocation4 + $0x38] sm:$0xff]  ;;  %v4197_v60 = vpack.c.bf16 %v990_v55, %v989_v54 }
 0x1a7   : > { %v4195_v58 = vpack.c.bf16 %v988_v52, %v987_v51  ;;  %v992_v59 = vld [vmem:[#allocation4 + $0x28] sm:$0xff] }
 0x1a8   : > { %v4199_v61 = vpack.c.bf16 %v992_v59, %v991_v56 }
 0x1a9   : > { %v2864_v62 = vld [vmem:[#allocation10 + $0x38] sm:$0xff]  ;;  %v2863_v63 = vld [vmem:[#allocation10 + $0x30] sm:$0xff]  ;;  %v2862_v0 = vld [vmem:[#allocation10 + $0x28] sm:$0xff] }
 0x1aa   : > { %1072 = vmatpush.bf16.msra.mxu0 %v2864_v62  ;;  %3055 = vmatpush.bf16.msra.mxu1 %v2864_v62  ;;  %v2861_v1 = vld [vmem:[#allocation10 + $0x20] sm:$0xff]  ;;  %v2860_v2 = vld [vmem:[#allocation10 + $0x18] sm:$0xff]  ;;  %v2859_v3 = vld [vmem:[#allocation10 + $0x10] sm:$0xff] }
 0x1ab   : > { %3056 = vmatpush.bf16.msra.mxu2 %v2864_v62  ;;  %3057 = vmatpush.bf16.msra.mxu3 %v2864_v62  ;;  %v2858_v4 = vld [vmem:[#allocation10 + $0x8] sm:$0xff]  ;;  %v2857_v5 = vld [vmem:[#allocation10] sm:$0xff] }
 0x1ac   : > { %v3286_v8 = vld [vmem:[#allocation11] ss:$0 sm:$0xff] }
 0x1ae   : > { %1073 = vmatpush.bf16.msra.mxu0 %v2863_v63  ;;  %3058 = vmatpush.bf16.msra.mxu1 %v2863_v63 }
 0x1af   : > { %3059 = vmatpush.bf16.msra.mxu2 %v2863_v63  ;;  %3060 = vmatpush.bf16.msra.mxu3 %v2863_v63 }
 0x1b2   : > { %1074 = vmatpush.bf16.msra.mxu0 %v2862_v0  ;;  %3061 = vmatpush.bf16.msra.mxu1 %v2862_v0 }
 0x1b3   : > { %3062 = vmatpush.bf16.msra.mxu2 %v2862_v0  ;;  %3063 = vmatpush.bf16.msra.mxu3 %v2862_v0 }
 0x1b6   : > { %1075 = vmatpush.bf16.msra.mxu0 %v2861_v1  ;;  %3064 = vmatpush.bf16.msra.mxu1 %v2861_v1 }
 0x1b7   : > { %3065 = vmatpush.bf16.msra.mxu2 %v2861_v1  ;;  %3066 = vmatpush.bf16.msra.mxu3 %v2861_v1 }
 0x1ba   : > { %1076 = vmatpush.bf16.msra.mxu0 %v2860_v2  ;;  %3067 = vmatpush.bf16.msra.mxu1 %v2860_v2 }
 0x1bb   : > { %3068 = vmatpush.bf16.msra.mxu2 %v2860_v2  ;;  %3069 = vmatpush.bf16.msra.mxu3 %v2860_v2 }
 0x1be   : > { %1077 = vmatpush.bf16.msra.mxu0 %v2859_v3  ;;  %3070 = vmatpush.bf16.msra.mxu1 %v2859_v3 }
 0x1bf   : > { %3071 = vmatpush.bf16.msra.mxu2 %v2859_v3  ;;  %3072 = vmatpush.bf16.msra.mxu3 %v2859_v3 }
 0x1c2   : > { %1078 = vmatpush.bf16.msra.mxu0 %v2858_v4  ;;  %3073 = vmatpush.bf16.msra.mxu1 %v2858_v4 }
 0x1c3   : > { %3074 = vmatpush.bf16.msra.mxu2 %v2858_v4  ;;  %3075 = vmatpush.bf16.msra.mxu3 %v2858_v4 }
 0x1c6   : > { %1079 = vmatpush.bf16.msra.mxu0 %v2857_v5  ;;  %3076 = vmatpush.bf16.msra.mxu1 %v2857_v5 }
 0x1c7   : > { %3077 = vmatpush.bf16.msra.mxu2 %v2857_v5  ;;  %3078 = vmatpush.bf16.msra.mxu3 %v2857_v5 }
 0x1c9   : > { %1080 = vmatmul.bf16.vlgmr.msra.gmra.mxu0 %v4185_v45  ;;  %1090 = vmatmul.bf16.vlgmr.msra.gmra.mxu1 %v4189_v49 }
 0x1ca   : > { %1100 = vmatmul.bf16.vlgmr.msra.gmra.mxu2 %v4193_v57  ;;  %1110 = vmatmul.bf16.vlgmr.msra.gmra.mxu3 %v4197_v60 }
 0x1d9   : > { %1085 = vmatmul.bf16.gmra.mxu0 %v4187_v48  ;;  %1095 = vmatmul.bf16.gmra.mxu1 %v4191_v53 }
 0x1da   : > { %1105 = vmatmul.bf16.gmra.mxu2 %v4195_v58  ;;  %1115 = vmatmul.bf16.gmra.mxu3 %v4199_v61 }
 0x246   : > { %v1081_v6 = vpop.f32.mrf.mxu0  ;;  %v1091_v7 = vpop.f32.mrf.mxu1 }
 0x247   : > { %v1082_v9 = vadd.f32 %v3286_v8, %v1081_v6  ;;  %v1092_v10 = vadd.f32 %v3286_v8, %v1091_v7 }
 0x249   : > { %v1121_v18 = vmax.f32 %v1082_v9, 0.0  ;;  %v1125_v19 = vmax.f32 %v1092_v10, 0.0 }
 0x24d   : > { %v1101_v11 = vpop.f32.mrf.mxu2  ;;  %v1111_v12 = vpop.f32.mrf.mxu3 }
 0x24e   : > { %v1083_v13 = vpop.f32.mrf.mxu0  ;;  %v1093_v15 = vpop.f32.mrf.mxu1  ;;  %v1102_v25 = vadd.f32 %v3286_v8, %v1101_v11  ;;  %v1112_v26 = vadd.f32 %v3286_v8, %v1111_v12 }
 0x24f   : > { %v1084_v16 = vadd.f32 %v3286_v8, %v1083_v13  ;;  %v1094_v17 = vadd.f32 %v3286_v8, %v1093_v15 }
 0x250   : > { %v1129_v33 = vmax.f32 %v1102_v25, 0.0  ;;  %v1133_v34 = vmax.f32 %v1112_v26, 0.0 }
 0x251   : > { %v1122_v21 = vmax.f32 %v1084_v16, 0.0  ;;  %v1126_v22 = vmax.f32 %v1094_v17, 0.0 }
 0x253   : > { %v2940_v23 = vpack.c.bf16 %v1122_v21, %v1121_v18  ;;  %v2950_v24 = vpack.c.bf16 %v1126_v22, %v1125_v19 }
 0x255   : > { %2941 = vst [vmem:[%s4211_s1] sm:$0xff] %v2940_v23   ;;  %v1103_v27 = vpop.f32.mrf.mxu2  ;;  %v1113_v28 = vpop.f32.mrf.mxu3 }
 0x256   : > { %3018 = vst [vmem:[%s4211_s1 + $0x10] sm:$0xff] %v2950_v24   ;;  %v1104_v29 = vadd.f32 %v3286_v8, %v1103_v27  ;;  %v1114_v30 = vadd.f32 %v3286_v8, %v1113_v28  ;;  %v1086_v31 = vpop.f32.mrf.mxu0  ;;  %v1096_v32 = vpop.f32.mrf.mxu1 }
 0x257   : > { %v1087_v39 = vadd.f32 %v3286_v8, %v1086_v31  ;;  %v1097_v40 = vadd.f32 %v3286_v8, %v1096_v32 }
 0x258   : > { %v1130_v35 = vmax.f32 %v1104_v29, 0.0  ;;  %v1134_v36 = vmax.f32 %v1114_v30, 0.0 }
 0x259   : > { %v1123_v20 = vmax.f32 %v1087_v39, 0.0  ;;  %v1127_v47 = vmax.f32 %v1097_v40, 0.0 }
 0x25a   : > { %v2960_v37 = vpack.c.bf16 %v1130_v35, %v1129_v33  ;;  %v2970_v38 = vpack.c.bf16 %v1134_v36, %v1133_v34 }
 0x25c   : > { %3020 = vst [vmem:[%s4211_s1 + $0x20] sm:$0xff] %v2960_v37  }
 0x25d   : > { %3022 = vst [vmem:[%s4211_s1 + $0x30] sm:$0xff] %v2970_v38   ;;  %v1106_v41 = vpop.f32.mrf.mxu2  ;;  %v1116_v42 = vpop.f32.mrf.mxu3 }
 0x25e   : > { %v1088_v43 = vpop.f32.mrf.mxu0  ;;  %v1098_v14 = vpop.f32.mrf.mxu1  ;;  %v1107_v55 = vadd.f32 %v3286_v8, %v1106_v41  ;;  %v1117_v56 = vadd.f32 %v3286_v8, %v1116_v42 }
 0x25f   : > { %v1089_v44 = vadd.f32 %v3286_v8, %v1088_v43  ;;  %v1099_v46 = vadd.f32 %v3286_v8, %v1098_v14 }
 0x260   : > { %v1131_v1 = vmax.f32 %v1107_v55, 0.0  ;;  %v1135_v2 = vmax.f32 %v1117_v56, 0.0 }
 0x261   : > { %v1124_v50 = vmax.f32 %v1089_v44, 0.0  ;;  %v1128_v51 = vmax.f32 %v1099_v46, 0.0 }
 0x263   : > { %v2945_v52 = vpack.c.bf16 %v1124_v50, %v1123_v20  ;;  %v2955_v54 = vpack.c.bf16 %v1128_v51, %v1127_v47 }
 0x265   : > { %3017 = vst [vmem:[%s4211_s1 + $0x8] sm:$0xff] %v2945_v52   ;;  %v1108_v59 = vpop.f32.mrf.mxu2  ;;  %v1118_v62 = vpop.f32.mrf.mxu3 }
 0x266   : > { %3019 = vst [vmem:[%s4211_s1 + $0x18] sm:$0xff] %v2955_v54   ;;  %v1109_v63 = vadd.f32 %v3286_v8, %v1108_v59  ;;  %v1119_v0 = vadd.f32 %v3286_v8, %v1118_v62 }
 0x268   : > { %v1132_v3 = vmax.f32 %v1109_v63, 0.0  ;;  %v1136_v4 = vmax.f32 %v1119_v0, 0.0 }
 0x26a   : > { %v2965_v5 = vpack.c.bf16 %v1132_v3, %v1131_v1  ;;  %v2975_v6 = vpack.c.bf16 %v1136_v4, %v1135_v2 }
 0x26c   : > { %3021 = vst [vmem:[%s4211_s1 + $0x28] sm:$0xff] %v2965_v5  }
 0x26d   : > { %3023 = vst [vmem:[%s4211_s1 + $0x38] sm:$0xff] %v2975_v6  }
 0x26e PF: > { %s4475_s4 = sld [smem:[#allocation29_spill]] }
 0x274   : > { %p2553_p13 = scmp.ne.s32.totalorder %s4475_s4, 1 }
 0x275   : > { %s1325_s5 = sshra.s32 (!%p2553_p13), %s4183_s9, 3 }
 0x276   : > { %1175 = sbr.rel (%p2553_p13) target bundleno = 832 (0x340), region = 124  ;;  %s2586_s6 = sshll.u32 (!%p2553_p13), %s1325_s5, 2 }
 0x277   : > { %s4231_s8 = scalar_lea.vmem (!%p2553_p13), [#allocation3], %s2586_s6 }
 0x27b   : > { %v2872_v7 = vld [vmem:[#allocation13 + $0x38] sm:$0xff]  ;;  %v2871_v9 = vld [vmem:[#allocation13 + $0x30] sm:$0xff]  ;;  %v2870_v8 = vld [vmem:[#allocation13 + $0x28] sm:$0xff] }
 0x27c   : > { %1244 = vmatpush.bf16.msra.mxu0 %v2872_v7  ;;  %3079 = vmatpush.bf16.msra.mxu1 %v2872_v7  ;;  %v2869_v10 = vld [vmem:[#allocation13 + $0x20] sm:$0xff]  ;;  %v2868_v11 = vld [vmem:[#allocation13 + $0x18] sm:$0xff]  ;;  %v2867_v12 = vld [vmem:[#allocation13 + $0x10] sm:$0xff] }
 0x27d   : > { %3080 = vmatpush.bf16.msra.mxu2 %v2872_v7  ;;  %3081 = vmatpush.bf16.msra.mxu3 %v2872_v7  ;;  %v2866_v13 = vld [vmem:[#allocation13 + $0x8] sm:$0xff]  ;;  %v2865_v15 = vld [vmem:[#allocation13] sm:$0xff] }
 0x27e   : > { %v3287_v18 = vld [vmem:[#allocation14] ss:$0 sm:$0xff] }
 0x280   : > { %1245 = vmatpush.bf16.msra.mxu0 %v2871_v9  ;;  %3082 = vmatpush.bf16.msra.mxu1 %v2871_v9 }
 0x281   : > { %3083 = vmatpush.bf16.msra.mxu2 %v2871_v9  ;;  %3084 = vmatpush.bf16.msra.mxu3 %v2871_v9 }
 0x284   : > { %1246 = vmatpush.bf16.msra.mxu0 %v2870_v8  ;;  %3085 = vmatpush.bf16.msra.mxu1 %v2870_v8 }
 0x285   : > { %3086 = vmatpush.bf16.msra.mxu2 %v2870_v8  ;;  %3087 = vmatpush.bf16.msra.mxu3 %v2870_v8 }
 0x288   : > { %1247 = vmatpush.bf16.msra.mxu0 %v2869_v10  ;;  %3088 = vmatpush.bf16.msra.mxu1 %v2869_v10 }
 0x289   : > { %3089 = vmatpush.bf16.msra.mxu2 %v2869_v10  ;;  %3090 = vmatpush.bf16.msra.mxu3 %v2869_v10 }
 0x28c   : > { %1248 = vmatpush.bf16.msra.mxu0 %v2868_v11  ;;  %3091 = vmatpush.bf16.msra.mxu1 %v2868_v11 }
 0x28d   : > { %3092 = vmatpush.bf16.msra.mxu2 %v2868_v11  ;;  %3093 = vmatpush.bf16.msra.mxu3 %v2868_v11 }
 0x290   : > { %1249 = vmatpush.bf16.msra.mxu0 %v2867_v12  ;;  %3094 = vmatpush.bf16.msra.mxu1 %v2867_v12 }
 0x291   : > { %3095 = vmatpush.bf16.msra.mxu2 %v2867_v12  ;;  %3096 = vmatpush.bf16.msra.mxu3 %v2867_v12 }
 0x294   : > { %1250 = vmatpush.bf16.msra.mxu0 %v2866_v13  ;;  %3097 = vmatpush.bf16.msra.mxu1 %v2866_v13 }
 0x295   : > { %3098 = vmatpush.bf16.msra.mxu2 %v2866_v13  ;;  %3099 = vmatpush.bf16.msra.mxu3 %v2866_v13 }
 0x298   : > { %1251 = vmatpush.bf16.msra.mxu0 %v2865_v15  ;;  %3100 = vmatpush.bf16.msra.mxu1 %v2865_v15 }
 0x299   : > { %3101 = vmatpush.bf16.msra.mxu2 %v2865_v15  ;;  %3102 = vmatpush.bf16.msra.mxu3 %v2865_v15 }
 0x29b   : > { %1252 = vmatmul.bf16.vlgmr.msra.gmra.mxu0 %v4185_v45  ;;  %1262 = vmatmul.bf16.vlgmr.msra.gmra.mxu1 %v4189_v49 }
 0x29c   : > { %1272 = vmatmul.bf16.vlgmr.msra.gmra.mxu2 %v4193_v57  ;;  %1282 = vmatmul.bf16.vlgmr.msra.gmra.mxu3 %v4197_v60 }
 0x2ab   : > { %1257 = vmatmul.bf16.gmra.mxu0 %v4187_v48  ;;  %1267 = vmatmul.bf16.gmra.mxu1 %v4191_v53 }
 0x2ac   : > { %1277 = vmatmul.bf16.gmra.mxu2 %v4195_v58  ;;  %1287 = vmatmul.bf16.gmra.mxu3 %v4199_v61 }
 0x318   : > { %v1253_v16 = vpop.f32.mrf.mxu0  ;;  %v1263_v17 = vpop.f32.mrf.mxu1 }
 0x319   : > { %v1254_v19 = vadd.f32 %v3287_v18, %v1253_v16  ;;  %v1264_v21 = vadd.f32 %v3287_v18, %v1263_v17 }
 0x31b   : > { %v1293_v28 = vmax.f32 %v1254_v19, 0.0  ;;  %v1297_v29 = vmax.f32 %v1264_v21, 0.0 }
 0x31f   : > { %v1273_v22 = vpop.f32.mrf.mxu2  ;;  %v1283_v23 = vpop.f32.mrf.mxu3 }
 0x320   : > { %v1255_v24 = vpop.f32.mrf.mxu0  ;;  %v1265_v25 = vpop.f32.mrf.mxu1  ;;  %v1274_v34 = vadd.f32 %v3287_v18, %v1273_v22  ;;  %v1284_v35 = vadd.f32 %v3287_v18, %v1283_v23 }
 0x321   : > { %v1256_v26 = vadd.f32 %v3287_v18, %v1255_v24  ;;  %v1266_v27 = vadd.f32 %v3287_v18, %v1265_v25 }
 0x322   : > { %v1301_v42 = vmax.f32 %v1274_v34, 0.0  ;;  %v1305_v43 = vmax.f32 %v1284_v35, 0.0 }
 0x323   : > { %v1294_v30 = vmax.f32 %v1256_v26, 0.0  ;;  %v1298_v31 = vmax.f32 %v1266_v27, 0.0 }
 0x325   : > { %v2980_v32 = vpack.c.bf16 %v1294_v30, %v1293_v28  ;;  %v2990_v33 = vpack.c.bf16 %v1298_v31, %v1297_v29 }
 0x327   : > { %2981 = vst [vmem:[%s4231_s8] sm:$0xff] %v2980_v32   ;;  %v1275_v36 = vpop.f32.mrf.mxu2  ;;  %v1285_v37 = vpop.f32.mrf.mxu3 }
 0x328   : > { %3025 = vst [vmem:[%s4231_s8 + $0x10] sm:$0xff] %v2990_v33   ;;  %v1276_v38 = vadd.f32 %v3287_v18, %v1275_v36  ;;  %v1286_v39 = vadd.f32 %v3287_v18, %v1285_v37  ;;  %v1258_v40 = vpop.f32.mrf.mxu0  ;;  %v1268_v41 = vpop.f32.mrf.mxu1 }
 0x329   : > { %v1259_v47 = vadd.f32 %v3287_v18, %v1258_v40  ;;  %v1269_v50 = vadd.f32 %v3287_v18, %v1268_v41 }
 0x32a   : > { %v1302_v14 = vmax.f32 %v1276_v38, 0.0  ;;  %v1306_v44 = vmax.f32 %v1286_v39, 0.0 }
 0x32b   : > { %v1295_v62 = vmax.f32 %v1259_v47, 0.0  ;;  %v1299_v63 = vmax.f32 %v1269_v50, 0.0 }
 0x32c   : > { %v3000_v46 = vpack.c.bf16 %v1302_v14, %v1301_v42  ;;  %v3010_v20 = vpack.c.bf16 %v1306_v44, %v1305_v43 }
 0x32e   : > { %3027 = vst [vmem:[%s4231_s8 + $0x20] sm:$0xff] %v3000_v46  }
 0x32f   : > { %3029 = vst [vmem:[%s4231_s8 + $0x30] sm:$0xff] %v3010_v20   ;;  %v1278_v51 = vpop.f32.mrf.mxu2  ;;  %v1288_v52 = vpop.f32.mrf.mxu3 }
 0x330   : > { %v1260_v54 = vpop.f32.mrf.mxu0  ;;  %v1270_v55 = vpop.f32.mrf.mxu1  ;;  %v1279_v4 = vadd.f32 %v3287_v18, %v1278_v51  ;;  %v1289_v5 = vadd.f32 %v3287_v18, %v1288_v52 }
 0x331   : > { %v1261_v56 = vadd.f32 %v3287_v18, %v1260_v54  ;;  %v1271_v59 = vadd.f32 %v3287_v18, %v1270_v55 }
 0x332   : > { %v1303_v10 = vmax.f32 %v1279_v4, 0.0  ;;  %v1307_v11 = vmax.f32 %v1289_v5, 0.0 }
 0x333   : > { %v1296_v0 = vmax.f32 %v1261_v56, 0.0  ;;  %v1300_v1 = vmax.f32 %v1271_v59, 0.0 }
 0x335   : > { %v2985_v2 = vpack.c.bf16 %v1296_v0, %v1295_v62  ;;  %v2995_v3 = vpack.c.bf16 %v1300_v1, %v1299_v63 }
 0x337   : > { %3024 = vst [vmem:[%s4231_s8 + $0x8] sm:$0xff] %v2985_v2   ;;  %v1280_v6 = vpop.f32.mrf.mxu2  ;;  %v1290_v7 = vpop.f32.mrf.mxu3 }
 0x338   : > { %3026 = vst [vmem:[%s4231_s8 + $0x18] sm:$0xff] %v2995_v3   ;;  %v1281_v9 = vadd.f32 %v3287_v18, %v1280_v6  ;;  %v1291_v8 = vadd.f32 %v3287_v18, %v1290_v7 }
 0x33a   : > { %v1304_v12 = vmax.f32 %v1281_v9, 0.0  ;;  %v1308_v13 = vmax.f32 %v1291_v8, 0.0 }
 0x33c   : > { %v3005_v15 = vpack.c.bf16 %v1304_v12, %v1303_v10  ;;  %v3015_v16 = vpack.c.bf16 %v1308_v13, %v1307_v11 }
 0x33e   : > { %3028 = vst [vmem:[%s4231_s8 + $0x28] sm:$0xff] %v3005_v15  }
 0x33f   : > { %3030 = vst [vmem:[%s4231_s8 + $0x38] sm:$0xff] %v3015_v16  }
 0x340 PF: > { %s4476_s14 = sld [smem:[#allocation29_spill]] }
 0x346   : > { %p2587_p0 = scmp.ne.s32.totalorder %s4476_s14, 2 }
 0x347   : > { %s4477_s19 = sld [smem:[#allocation37_spill]] (!%p2587_p0)  ;;  %s4343_s12 = scalar_lea.vmem (!%p2587_p0), [#allocation20], %s4183_s9 }
 0x348   : > { %1348 = sbr.rel (%p2587_p0) target bundleno = 1424 (0x590), region = 128  ;;  %s4478_s13 = sld [smem:[#allocation39_spill]] (!%p2587_p0) }
 0x349   : > { %s4479_s3 = sld [smem:[#allocation40_spill]] (!%p2587_p0) }
 0x34d   : > { %v2646_v17 = vld [vmem:[#allocation16 + $0x70] sm:$0xf]  ;;  %v2888_v19 = vld [vmem:[#allocation16 + $0x74] sm:$0xf0]  ;;  %v2887_v21 = vld [vmem:[#allocation16 + $0x74] sm:$0xf] }
 0x34e   : > { %v2647_v22 = vor.u32 %v2888_v19, %v2646_v17  ;;  %v2648_v23 = vld [vmem:[#allocation16 + $0x78] sm:$0xf0]  ;;  %v2638_v24 = vld [vmem:[#allocation16 + $0x60] sm:$0xf]  ;;  %v2886_v25 = vld [vmem:[#allocation16 + $0x64] sm:$0xf0] }
 0x34f   : > { %v2651_v18 = vor.u32 %v2887_v21, %v2648_v23  ;;  %v2885_v26 = vld [vmem:[#allocation16 + $0x64] sm:$0xf]  ;;  %v2640_v27 = vld [vmem:[#allocation16 + $0x68] sm:$0xf0]  ;;  %v2639_v28 = vor.u32 %v2886_v25, %v2638_v24  ;;  %v2630_v30 = vld [vmem:[#allocation16 + $0x50] sm:$0xf] }
 0x350   : > { %1451 = vmatpush.bf16.msra.mxu0 %v2647_v22  ;;  %v2643_v29 = vor.u32 %v2885_v26, %v2640_v27  ;;  %v2884_v31 = vld [vmem:[#allocation16 + $0x54] sm:$0xf0]  ;;  %v2883_v32 = vld [vmem:[#allocation16 + $0x54] sm:$0xf]  ;;  %v2632_v33 = vld [vmem:[#allocation16 + $0x58] sm:$0xf0] }
 0x351   : > { %1500 = vmatpush.bf16.msra.mxu1 %v2651_v18  ;;  %v2631_v34 = vor.u32 %v2884_v31, %v2630_v30  ;;  %v2635_v35 = vor.u32 %v2883_v32, %v2632_v33  ;;  %v2622_v36 = vld [vmem:[#allocation16 + $0x40] sm:$0xf]  ;;  %v2882_v37 = vld [vmem:[#allocation16 + $0x44] sm:$0xf0]  ;;  %v2881_v38 = vld [vmem:[#allocation16 + $0x44] sm:$0xf] }
 0x352   : > { %v2624_v39 = vld [vmem:[#allocation16 + $0x48] sm:$0xf0]  ;;  %v2623_v40 = vor.u32 %v2882_v37, %v2622_v36  ;;  %v2614_v42 = vld [vmem:[#allocation16 + $0x30] sm:$0xf]  ;;  %v2880_v43 = vld [vmem:[#allocation16 + $0x34] sm:$0xf0] }
 0x353   : > { %v2627_v41 = vor.u32 %v2881_v38, %v2624_v39  ;;  %v2879_v14 = vld [vmem:[#allocation16 + $0x34] sm:$0xf]  ;;  %v2616_v44 = vld [vmem:[#allocation16 + $0x38] sm:$0xf0]  ;;  %v2615_v46 = vor.u32 %v2880_v43, %v2614_v42  ;;  %v2606_v47 = vld [vmem:[#allocation16 + $0x20] sm:$0xf] }
 0x354   : > { %1452 = vmatpush.bf16.msra.mxu0 %v2639_v28  ;;  %v2619_v20 = vor.u32 %v2879_v14, %v2616_v44  ;;  %v2878_v50 = vld [vmem:[#allocation16 + $0x24] sm:$0xf0]  ;;  %v2877_v51 = vld [vmem:[#allocation16 + $0x24] sm:$0xf]  ;;  %v2608_v52 = vld [vmem:[#allocation16 + $0x28] sm:$0xf0] }
 0x355   : > { %1501 = vmatpush.bf16.msra.mxu1 %v2643_v29  ;;  %v2607_v54 = vor.u32 %v2878_v50, %v2606_v47  ;;  %v2611_v55 = vor.u32 %v2877_v51, %v2608_v52  ;;  %v2598_v56 = vld [vmem:[#allocation16 + $0x10] sm:$0xf]  ;;  %v2876_v59 = vld [vmem:[#allocation16 + $0x14] sm:$0xf0]  ;;  %v2875_v62 = vld [vmem:[#allocation16 + $0x14] sm:$0xf] }
 0x356   : > { %v2600_v63 = vld [vmem:[#allocation16 + $0x18] sm:$0xf0]  ;;  %v2599_v0 = vor.u32 %v2876_v59, %v2598_v56  ;;  %v2590_v2 = vld [vmem:[#allocation16] sm:$0xf]  ;;  %v2874_v3 = vld [vmem:[#allocation16 + $0x4] sm:$0xf0] }
 0x357   : > { %v2603_v1 = vor.u32 %v2875_v62, %v2600_v63  ;;  %v2873_v4 = vld [vmem:[#allocation16 + $0x4] sm:$0xf]  ;;  %v2592_v5 = vld [vmem:[#allocation16 + $0x8] sm:$0xf0]  ;;  %v2903_v6 = vld [vmem:[#allocation17 + $0x74] sm:$0xf]  ;;  %v2591_v10 = vor.u32 %v2874_v3, %v2590_v2 }
 0x358   : > { %1453 = vmatpush.bf16.msra.mxu0 %v2631_v34  ;;  %v2712_v7 = vld [vmem:[#allocation17 + $0x78] sm:$0xf0]  ;;  %v2919_v9 = vld [vmem:[#allocation17 + $0xf4] sm:$0xf]  ;;  %v2595_v11 = vor.u32 %v2873_v4, %v2592_v5  ;;  %v2901_v15 = vld [vmem:[#allocation17 + $0x64] sm:$0xf] }
 0x359   : > { %1502 = vmatpush.bf16.msra.mxu1 %v2635_v35  ;;  %v2776_v8 = vld [vmem:[#allocation17 + $0xf8] sm:$0xf0]  ;;  %v2715_v12 = vor.u32 %v2903_v6, %v2712_v7  ;;  %v2704_v16 = vld [vmem:[#allocation17 + $0x68] sm:$0xf0]  ;;  %v2917_v17 = vld [vmem:[#allocation17 + $0xe4] sm:$0xf] }
 0x35a   : > { %v2779_v13 = vor.u32 %v2919_v9, %v2776_v8  ;;  %v2707_v19 = vor.u32 %v2901_v15, %v2704_v16  ;;  %v2768_v21 = vld [vmem:[#allocation17 + $0xe8] sm:$0xf0]  ;;  %v2899_v23 = vld [vmem:[#allocation17 + $0x54] sm:$0xf]  ;;  %v2696_v24 = vld [vmem:[#allocation17 + $0x58] sm:$0xf0] }
 0x35b   : > { %v2771_v22 = vor.u32 %v2917_v17, %v2768_v21  ;;  %v2915_v25 = vld [vmem:[#allocation17 + $0xd4] sm:$0xf]  ;;  %v2699_v18 = vor.u32 %v2899_v23, %v2696_v24  ;;  %v2760_v26 = vld [vmem:[#allocation17 + $0xd8] sm:$0xf0]  ;;  %v2688_v28 = vld [vmem:[#allocation17 + $0x48] sm:$0xf0] }
 0x35c   : > { %1454 = vmatpush.bf16.msra.mxu0 %v2623_v40  ;;  %v2763_v27 = vor.u32 %v2915_v25, %v2760_v26  ;;  %v2913_v29 = vld [vmem:[#allocation17 + $0xc4] sm:$0xf]  ;;  %v2752_v31 = vld [vmem:[#allocation17 + $0xc8] sm:$0xf0]  ;;  %v2680_v33 = vld [vmem:[#allocation17 + $0x38] sm:$0xf0] }
 0x35d   : > { %1503 = vmatpush.bf16.msra.mxu1 %v2627_v41  ;;  %v2755_v32 = vor.u32 %v2913_v29, %v2752_v31  ;;  %v2911_v34 = vld [vmem:[#allocation17 + $0xb4] sm:$0xf]  ;;  %v2744_v36 = vld [vmem:[#allocation17 + $0xb8] sm:$0xf0]  ;;  %v2672_v38 = vld [vmem:[#allocation17 + $0x28] sm:$0xf0] }
 0x35e   : > { %v2747_v37 = vor.u32 %v2911_v34, %v2744_v36  ;;  %v2909_v39 = vld [vmem:[#allocation17 + $0xa4] sm:$0xf]  ;;  %v2736_v41 = vld [vmem:[#allocation17 + $0xa8] sm:$0xf0]  ;;  %v2710_v42 = vld [vmem:[#allocation17 + $0x70] sm:$0xf] }
 0x35f   : > { %v2904_v43 = vld [vmem:[#allocation17 + $0x74] sm:$0xf0]  ;;  %v2774_v44 = vld [vmem:[#allocation17 + $0xf0] sm:$0xf]  ;;  %v2702_v47 = vld [vmem:[#allocation17 + $0x60] sm:$0xf] }
 0x360   : > { %1455 = vmatpush.bf16.msra.mxu0 %v2615_v46  ;;  %v2711_v14 = vor.u32 %v2904_v43, %v2710_v42  ;;  %v2920_v46 = vld [vmem:[#allocation17 + $0xf4] sm:$0xf0]  ;;  %v2902_v50 = vld [vmem:[#allocation17 + $0x64] sm:$0xf0]  ;;  %v2766_v51 = vld [vmem:[#allocation17 + $0xe0] sm:$0xf] }
 0x361   : > { %1504 = vmatpush.bf16.msra.mxu1 %v2619_v20  ;;  %v2775_v20 = vor.u32 %v2920_v46, %v2774_v44  ;;  %v2918_v52 = vld [vmem:[#allocation17 + $0xe4] sm:$0xf0]  ;;  %v2664_v56 = vld [vmem:[#allocation17 + $0x18] sm:$0xf0]  ;;  %v2694_v59 = vld [vmem:[#allocation17 + $0x50] sm:$0xf] }
 0x362   : > { %1795 = vmatpush.bf16.msra.mxu2 %v2711_v14  ;;  %v2900_v63 = vld [vmem:[#allocation17 + $0x54] sm:$0xf0]  ;;  %v2907_v4 = vld [vmem:[#allocation17 + $0x94] sm:$0xf]  ;;  %v2728_v5 = vld [vmem:[#allocation17 + $0x98] sm:$0xf0] }
 0x363   : > { %1844 = vmatpush.bf16.msra.mxu3 %v2775_v20  ;;  %v2695_v2 = vor.u32 %v2900_v63, %v2694_v59  ;;  %v2686_v6 = vld [vmem:[#allocation17 + $0x40] sm:$0xf]  ;;  %v2731_v7 = vor.u32 %v2907_v4, %v2728_v5  ;;  %v2898_v9 = vld [vmem:[#allocation17 + $0x44] sm:$0xf0]  ;;  %v2742_v15 = vld [vmem:[#allocation17 + $0xb0] sm:$0xf] }
 0x364   : > { %1456 = vmatpush.bf16.msra.mxu0 %v2607_v54  ;;  %v2767_v54 = vor.u32 %v2918_v52, %v2766_v51  ;;  %v2750_v8 = vld [vmem:[#allocation17 + $0xc0] sm:$0xf]  ;;  %v2912_v17 = vld [vmem:[#allocation17 + $0xb4] sm:$0xf0]  ;;  %v2910_v25 = vld [vmem:[#allocation17 + $0xa4] sm:$0xf0] }
 0x365   : > { %1505 = vmatpush.bf16.msra.mxu1 %v2611_v55  ;;  %v2891_v55 = vld [vmem:[#allocation17 + $0x14] sm:$0xf]  ;;  %v2670_v21 = vld [vmem:[#allocation17 + $0x20] sm:$0xf]  ;;  %v2889_v26 = vld [vmem:[#allocation17 + $0x4] sm:$0xf] }
 0x366   : > { %v2667_v62 = vor.u32 %v2891_v55, %v2664_v56  ;;  %v2734_v24 = vld [vmem:[#allocation17 + $0xa0] sm:$0xf]  ;;  %v2892_v29 = vld [vmem:[#allocation17 + $0x14] sm:$0xf0]  ;;  %v2720_v34 = vld [vmem:[#allocation17 + $0x88] sm:$0xf0] }
 0x367   : > { %1845 = vmatpush.bf16.msra.mxu3 %v2767_v54  ;;  %v2928_v14 = vld [vmem:[#allocation19 + $0x38] sm:$0xff] }
 0x368   : > { %1457 = vmatpush.bf16.msra.mxu0 %v2599_v0  ;;  %v2758_v0 = vld [vmem:[#allocation17 + $0xd0] sm:$0xf]  ;;  %v2936_v44 = vld [vmem:[#allocation19 + $0x78] sm:$0xff] }
 0x369   : > { %1506 = vmatpush.bf16.msra.mxu1 %v2603_v1  ;;  %v2916_v1 = vld [vmem:[#allocation17 + $0xd4] sm:$0xf0] }
 0x36a   : > { %v2759_v3 = vor.u32 %v2916_v1, %v2758_v0  ;;  %v2927_v0 = vld [vmem:[#allocation19 + $0x30] sm:$0xff] }
 0x36b   : > { %v2935_v1 = vld [vmem:[#allocation19 + $0x70] sm:$0xff] }
 0x36c   : > { %1458 = vmatpush.bf16.msra.mxu0 %v2591_v10  ;;  %v2687_v10 = vor.u32 %v2898_v9, %v2686_v6  ;;  %1846 = vmatpush.bf16.msra.mxu3 %v2759_v3 }
 0x36d   : > { %1507 = vmatpush.bf16.msra.mxu1 %v2595_v11 }
 0x36f   : > { %1459 = vmatmul.bf16.vlgmr.msra.gmra.mxu0 %v4185_v45 }
 0x370   : > { %1893 = vmatpush.bf16.msrb.mxu0 %v2715_v12  ;;  %1508 = vmatmul.bf16.vlgmr.msra.gmra.mxu1 %v4185_v45  ;;  %v2897_v45 = vld [vmem:[#allocation17 + $0x44] sm:$0xf]  ;;  %v2678_v12 = vld [vmem:[#allocation17 + $0x30] sm:$0xf] }
 0x371   : > { %1942 = vmatpush.bf16.msrb.mxu1 %v2779_v13  ;;  %v2691_v30 = vor.u32 %v2897_v45, %v2688_v28  ;;  %v2896_v13 = vld [vmem:[#allocation17 + $0x34] sm:$0xf0]  ;;  %v2662_v28 = vld [vmem:[#allocation17 + $0x10] sm:$0xf] }
 0x372   : > { %v2679_v16 = vor.u32 %v2896_v13, %v2678_v12  ;;  %v2663_v31 = vor.u32 %v2892_v29, %v2662_v28 }
 0x374   : > { %1894 = vmatpush.bf16.msrb.mxu0 %v2707_v19  ;;  %v2743_v19 = vor.u32 %v2912_v17, %v2742_v15  ;;  %v2934_v17 = vld [vmem:[#allocation19 + $0x68] sm:$0xff] }
 0x375   : > { %1943 = vmatpush.bf16.msrb.mxu1 %v2771_v22  ;;  %v2894_v22 = vld [vmem:[#allocation17 + $0x24] sm:$0xf0] }
 0x376   : > { %v2671_v23 = vor.u32 %v2894_v22, %v2670_v21 }
 0x378   : > { %1895 = vmatpush.bf16.msrb.mxu0 %v2699_v18  ;;  %v2735_v18 = vor.u32 %v2910_v25, %v2734_v24 }
 0x379   : > { %1944 = vmatpush.bf16.msrb.mxu1 %v2763_v27  ;;  %v2656_v27 = vld [vmem:[#allocation17 + $0x8] sm:$0xf0] }
 0x37a   : > { %v2659_v45 = vor.u32 %v2889_v26, %v2656_v27 }
 0x37c   : > { %1896 = vmatpush.bf16.msrb.mxu0 %v2691_v30  ;;  %v2726_v30 = vld [vmem:[#allocation17 + $0x90] sm:$0xf] }
 0x37d   : > { %1945 = vmatpush.bf16.msrb.mxu1 %v2755_v32  ;;  %v2908_v32 = vld [vmem:[#allocation17 + $0x94] sm:$0xf0] }
 0x37f   : > { %1464 = vmatmul.bf16.gmra.mxu0 %v4187_v48 }
 0x380   : > { %1513 = vmatmul.bf16.gmra.mxu1 %v4187_v48  ;;  %v2895_v48 = vld [vmem:[#allocation17 + $0x34] sm:$0xf] }
 0x381   : > { %v2683_v35 = vor.u32 %v2895_v48, %v2680_v33  ;;  %1946 = vmatpush.bf16.msrb.mxu1 %v2747_v37  ;;  %v2727_v48 = vor.u32 %v2908_v32, %v2726_v30  ;;  %v2905_v33 = vld [vmem:[#allocation17 + $0x84] sm:$0xf]  ;;  %v2718_v37 = vld [vmem:[#allocation17 + $0x80] sm:$0xf] }
 0x382   : > { %v2723_v36 = vor.u32 %v2905_v33, %v2720_v34  ;;  %v2925_v32 = vld [vmem:[#allocation19 + $0x20] sm:$0xff] }
 0x383   : > { %1897 = vmatpush.bf16.msrb.mxu0 %v2683_v35  ;;  %v2654_v35 = vld [vmem:[#allocation17] sm:$0xf] }
 0x38f   : > { %1469 = vmatmul.bf16.gmra.mxu0 %v4189_v49 }
 0x390   : > { %1518 = vmatmul.bf16.gmra.mxu1 %v4189_v49  ;;  %v2893_v49 = vld [vmem:[#allocation17 + $0x24] sm:$0xf] }
 0x391   : > { %v2675_v40 = vor.u32 %v2893_v49, %v2672_v38  ;;  %v2906_v49 = vld [vmem:[#allocation17 + $0x84] sm:$0xf0] }
 0x393   : > { %1898 = vmatpush.bf16.msrb.mxu0 %v2675_v40  ;;  %v1365_v40 = vld [vmem:[%s4477_s19] sm:$0x3] }
 0x394   : > { %v4261_v43 = vperm.slane %v1365_v40, 0 }
 0x397   : > { %1899 = vmatpush.bf16.msrb.mxu0 %v2667_v62 }
 0x39b   : > { %1900 = vmatpush.bf16.msrb.mxu0 %v2659_v45 }
 0x39f   : > { %1474 = vmatmul.bf16.gmra.mxu0 %v4191_v53 }
 0x3a0   : > { %1523 = vmatmul.bf16.gmra.mxu1 %v4191_v53  ;;  %v2739_v53 = vor.u32 %v2909_v39, %v2736_v41  ;;  %v2719_v39 = vor.u32 %v2906_v49, %v2718_v37 }
 0x3a2   : > { %1947 = vmatpush.bf16.msrb.mxu1 %v2739_v53  ;;  %v4263_v53 = vperm.slane %v1365_v40, 1 }
 0x3a6   : > { %1948 = vmatpush.bf16.msrb.mxu1 %v2731_v7 }
 0x3aa   : > { %1949 = vmatpush.bf16.msrb.mxu1 %v2723_v36 }
 0x3af   : > { %1479 = vmatmul.bf16.gmra.mxu0 %v4193_v57 }
 0x3b0   : > { %1528 = vmatmul.bf16.gmra.mxu1 %v4193_v57  ;;  %v2703_v57 = vor.u32 %v2902_v50, %v2702_v47 }
 0x3b2   : > { %1796 = vmatpush.bf16.msra.mxu2 %v2703_v57 }
 0x3b6   : > { %1797 = vmatpush.bf16.msra.mxu2 %v2695_v2 }
 0x3ba   : > { %1798 = vmatpush.bf16.msra.mxu2 %v2687_v10 }
 0x3be   : > { %1799 = vmatpush.bf16.msra.mxu2 %v2679_v16  ;;  %v2926_v16 = vld [vmem:[#allocation19 + $0x28] sm:$0xff] }
 0x3bf   : > { %1484 = vmatmul.bf16.gmra.mxu0 %v4195_v58 }
 0x3c0   : > { %1533 = vmatmul.bf16.gmra.mxu1 %v4195_v58  ;;  %v2914_v58 = vld [vmem:[#allocation17 + $0xc4] sm:$0xf0] }
 0x3c1   : > { %v2751_v11 = vor.u32 %v2914_v58, %v2750_v8 }
 0x3c2   : > { %1800 = vmatpush.bf16.msra.mxu2 %v2671_v23 }
 0x3c3   : > { %1847 = vmatpush.bf16.msra.mxu3 %v2751_v11 }
 0x3c6   : > { %1801 = vmatpush.bf16.msra.mxu2 %v2663_v31 }
 0x3c7   : > { %1848 = vmatpush.bf16.msra.mxu3 %v2743_v19 }
 0x3cb   : > { %1849 = vmatpush.bf16.msra.mxu3 %v2735_v18 }
 0x3cf   : > { %1489 = vmatmul.bf16.gmra.mxu0 %v4197_v60  ;;  %1850 = vmatpush.bf16.msra.mxu3 %v2727_v48  ;;  %v2933_v48 = vld [vmem:[#allocation19 + $0x60] sm:$0xff] }
 0x3d0   : > { %1538 = vmatmul.bf16.gmra.mxu1 %v4197_v60  ;;  %v2890_v60 = vld [vmem:[#allocation17 + $0x4] sm:$0xf0] }
 0x3d1   : > { %v2655_v38 = vor.u32 %v2890_v60, %v2654_v35 }
 0x3d3   : > { %1802 = vmatpush.bf16.msra.mxu2 %v2655_v38  ;;  %1851 = vmatpush.bf16.msra.mxu3 %v2719_v39 }
 0x3d7   : > { %2171 = vmatpush.bf16.msrb.mxu2 %v2928_v14  ;;  %2220 = vmatpush.bf16.msrb.mxu3 %v2936_v44 }
 0x3db   : > { %2172 = vmatpush.bf16.msrb.mxu2 %v2927_v0  ;;  %2221 = vmatpush.bf16.msrb.mxu3 %v2935_v1 }
 0x3df   : > { %1494 = vmatmul.bf16.gmra.mxu0 %v4199_v61  ;;  %2173 = vmatpush.bf16.msrb.mxu2 %v2926_v16 }
 0x3e0   : > { %1543 = vmatmul.bf16.gmra.mxu1 %v4199_v61  ;;  %2222 = vmatpush.bf16.msrb.mxu3 %v2934_v17  ;;  %v2922_v17 = vld [vmem:[#allocation19 + $0x8] sm:$0xff] }
 0x3e3   : > { %2174 = vmatpush.bf16.msrb.mxu2 %v2925_v32 }
 0x3e4   : > { %2223 = vmatpush.bf16.msrb.mxu3 %v2933_v48 }
 0x3ec   : > { %v1460_v41 = vpop.f32.mrf.mxu0 }
 0x3ed   : > { %v1509_v42 = vpop.f32.mrf.mxu1  ;;  %v1461_v46 = vadd.f32 %v1460_v41, %v4261_v43 }
 0x3ee   : > { %v1510_v20 = vadd.f32 %v1509_v42, %v4263_v53 }
 0x3ef   : > { %v1549_v57 = vmax.f32 %v1461_v46, 0.0  ;;  %v2924_v46 = vld [vmem:[#allocation19 + $0x18] sm:$0xff] }
 0x3f0   : > { %v1550_v54 = vmax.f32 %v1510_v20, 0.0  ;;  %v2932_v20 = vld [vmem:[#allocation19 + $0x58] sm:$0xff]  ;;  %2175 = vmatpush.bf16.msrb.mxu2 %v2924_v46 }
 0x3f1   : > { %2224 = vmatpush.bf16.msrb.mxu3 %v2932_v20 }
 0x3f4   : > { %v1462_v47 = vpop.f32.mrf.mxu0 }
 0x3f5   : > { %v1463_v61 = vadd.f32 %v1462_v47, %v4261_v43  ;;  %v1511_v50 = vpop.f32.mrf.mxu1 }
 0x3f6   : > { %v1512_v51 = vadd.f32 %v1511_v50, %v4263_v53 }
 0x3f7   : > { %v1551_v52 = vmax.f32 %v1463_v61, 0.0 }
 0x3f8   : > { %v1552_v55 = vmax.f32 %v1512_v51, 0.0 }
 0x3f9   : > { %v1581_v56 = vpack.c.bf16 %v1551_v52, %v1549_v57 }
 0x3fa   : > { %v1582_v59 = vpack.c.bf16 %v1552_v55, %v1550_v54 }
 0x3fb   : > { %1803 = vmatmul.bf16.vlgmr.msra.gmra.mxu2 %v1581_v56  ;;  %1901 = vmatmul.bf16.vlgmr.msrb.gmra.mxu0 %v1581_v56 }
 0x3fc   : > { %1852 = vmatmul.bf16.vlgmr.msra.gmra.mxu3 %v1582_v59  ;;  %1950 = vmatmul.bf16.vlgmr.msrb.gmra.mxu1 %v1582_v59  ;;  %v1465_v62 = vpop.f32.mrf.mxu0 }
 0x3fd   : > { %v1514_v63 = vpop.f32.mrf.mxu1  ;;  %v1466_v2 = vadd.f32 %v1465_v62, %v4261_v43 }
 0x3fe   : > { %v1515_v3 = vadd.f32 %v1514_v63, %v4263_v53 }
 0x3ff   : > { %v1553_v9 = vmax.f32 %v1466_v2, 0.0  ;;  %v2923_v2 = vld [vmem:[#allocation19 + $0x10] sm:$0xff] }
 0x400   : > { %v1554_v58 = vmax.f32 %v1515_v3, 0.0  ;;  %v2931_v3 = vld [vmem:[#allocation19 + $0x50] sm:$0xff]  ;;  %2176 = vmatpush.bf16.msrb.mxu2 %v2923_v2 }
 0x401   : > { %2225 = vmatpush.bf16.msrb.mxu3 %v2931_v3 }
 0x404   : > { %v1467_v4 = vpop.f32.mrf.mxu0  ;;  %2177 = vmatpush.bf16.msrb.mxu2 %v2922_v17 }
 0x405   : > { %v1468_v5 = vadd.f32 %v1467_v4, %v4261_v43  ;;  %v1516_v6 = vpop.f32.mrf.mxu1 }
 0x406   : > { %v1517_v7 = vadd.f32 %v1516_v6, %v4263_v53 }
 0x407   : > { %v1555_v8 = vmax.f32 %v1468_v5, 0.0 }
 0x408   : > { %v1556_v10 = vmax.f32 %v1517_v7, 0.0 }
 0x409   : > { %v1583_v11 = vpack.c.bf16 %v1555_v8, %v1553_v9 }
 0x40a   : > { %v1584_v12 = vpack.c.bf16 %v1556_v10, %v1554_v58 }
 0x40b   : > { %1808 = vmatmul.bf16.gmra.mxu2 %v1583_v11  ;;  %1906 = vmatmul.bf16.gmra.mxu0 %v1583_v11 }
 0x40c   : > { %1857 = vmatmul.bf16.gmra.mxu3 %v1584_v12  ;;  %1955 = vmatmul.bf16.gmra.mxu1 %v1584_v12  ;;  %v1470_v13 = vpop.f32.mrf.mxu0 }
 0x40d   : > { %v1519_v15 = vpop.f32.mrf.mxu1  ;;  %v1471_v19 = vadd.f32 %v1470_v13, %v4261_v43 }
 0x40e   : > { %v1520_v21 = vadd.f32 %v1519_v15, %v4263_v53 }
 0x40f   : > { %v1557_v18 = vmax.f32 %v1471_v19, 0.0  ;;  %v2930_v19 = vld [vmem:[#allocation19 + $0x48] sm:$0xff] }
 0x410   : > { %v1558_v27 = vmax.f32 %v1520_v21, 0.0  ;;  %2226 = vmatpush.bf16.msrb.mxu3 %v2930_v19 }
 0x414   : > { %v1472_v22 = vpop.f32.mrf.mxu0 }
 0x415   : > { %v1473_v23 = vadd.f32 %v1472_v22, %v4261_v43  ;;  %v1521_v24 = vpop.f32.mrf.mxu1 }
 0x416   : > { %v1522_v25 = vadd.f32 %v1521_v24, %v4263_v53 }
 0x417   : > { %v1559_v26 = vmax.f32 %v1473_v23, 0.0 }
 0x418   : > { %v1560_v45 = vmax.f32 %v1522_v25, 0.0 }
 0x419   : > { %v1585_v28 = vpack.c.bf16 %v1559_v26, %v1557_v18 }
 0x41a   : > { %v1586_v29 = vpack.c.bf16 %v1560_v45, %v1558_v27 }
 0x41b   : > { %1813 = vmatmul.bf16.gmra.mxu2 %v1585_v28  ;;  %1911 = vmatmul.bf16.gmra.mxu0 %v1585_v28 }
 0x41c   : > { %1862 = vmatmul.bf16.gmra.mxu3 %v1586_v29  ;;  %1960 = vmatmul.bf16.gmra.mxu1 %v1586_v29  ;;  %v1475_v30 = vpop.f32.mrf.mxu0 }
 0x41d   : > { %v1524_v31 = vpop.f32.mrf.mxu1  ;;  %v1476_v33 = vadd.f32 %v1475_v30, %v4261_v43 }
 0x41e   : > { %v1525_v34 = vadd.f32 %v1524_v31, %v4263_v53 }
 0x41f   : > { %v1561_v49 = vmax.f32 %v1476_v33, 0.0 }
 0x420   : > { %v1562_v39 = vmax.f32 %v1525_v34, 0.0  ;;  %v2921_v34 = vld [vmem:[#allocation19] sm:$0xff] }
 0x421   : > { %2178 = vmatpush.bf16.msrb.mxu2 %v2921_v34 }
 0x424   : > { %v1477_v35 = vpop.f32.mrf.mxu0 }
 0x425   : > { %v1478_v36 = vadd.f32 %v1477_v35, %v4261_v43  ;;  %v1526_v60 = vpop.f32.mrf.mxu1 }
 0x426   : > { %v1527_v37 = vadd.f32 %v1526_v60, %v4263_v53 }
 0x427   : > { %v1563_v38 = vmax.f32 %v1478_v36, 0.0 }
 0x428   : > { %v1564_v40 = vmax.f32 %v1527_v37, 0.0 }
 0x429   : > { %v1587_v41 = vpack.c.bf16 %v1563_v38, %v1561_v49  ;;  %v2929_v49 = vld [vmem:[#allocation19 + $0x40] sm:$0xff] }
 0x42a   : > { %v1588_v42 = vpack.c.bf16 %v1564_v40, %v1562_v39  ;;  %2227 = vmatpush.bf16.msrb.mxu3 %v2929_v49 }
 0x42b   : > { %1818 = vmatmul.bf16.gmra.mxu2 %v1587_v41  ;;  %1916 = vmatmul.bf16.gmra.mxu0 %v1587_v41 }
 0x42c   : > { %1867 = vmatmul.bf16.gmra.mxu3 %v1588_v42  ;;  %1965 = vmatmul.bf16.gmra.mxu1 %v1588_v42  ;;  %v1480_v14 = vpop.f32.mrf.mxu0 }
 0x42d   : > { %v1529_v44 = vpop.f32.mrf.mxu1  ;;  %v1481_v47 = vadd.f32 %v1480_v14, %v4261_v43 }
 0x42e   : > { %v1530_v61 = vadd.f32 %v1529_v44, %v4263_v53 }
 0x42f   : > { %v1565_v54 = vmax.f32 %v1481_v47, 0.0 }
 0x430   : > { %v1566_v56 = vmax.f32 %v1530_v61, 0.0 }
 0x434   : > { %v1482_v50 = vpop.f32.mrf.mxu0 }
 0x435   : > { %v1483_v51 = vadd.f32 %v1482_v50, %v4261_v43  ;;  %v1531_v57 = vpop.f32.mrf.mxu1 }
 0x436   : > { %v1532_v52 = vadd.f32 %v1531_v57, %v4263_v53 }
 0x437   : > { %v1567_v55 = vmax.f32 %v1483_v51, 0.0 }
 0x438   : > { %v1568_v59 = vmax.f32 %v1532_v52, 0.0 }
 0x439   : > { %v1589_v62 = vpack.c.bf16 %v1567_v55, %v1565_v54 }
 0x43a   : > { %v1590_v63 = vpack.c.bf16 %v1568_v59, %v1566_v56 }
 0x43b   : > { %1823 = vmatmul.bf16.gmra.mxu2 %v1589_v62  ;;  %1921 = vmatmul.bf16.gmra.mxu0 %v1589_v62 }
 0x43c   : > { %1872 = vmatmul.bf16.gmra.mxu3 %v1590_v63  ;;  %1970 = vmatmul.bf16.gmra.mxu1 %v1590_v63  ;;  %v1485_v0 = vpop.f32.mrf.mxu0 }
 0x43d   : > { %v1534_v1 = vpop.f32.mrf.mxu1  ;;  %v1486_v4 = vadd.f32 %v1485_v0, %v4261_v43 }
 0x43e   : > { %v1535_v5 = vadd.f32 %v1534_v1, %v4263_v53 }
 0x43f   : > { %v1569_v58 = vmax.f32 %v1486_v4, 0.0 }
 0x440   : > { %v1570_v11 = vmax.f32 %v1535_v5, 0.0 }
 0x444   : > { %v1487_v6 = vpop.f32.mrf.mxu0 }
 0x445   : > { %v1488_v7 = vadd.f32 %v1487_v6, %v4261_v43  ;;  %v1536_v9 = vpop.f32.mrf.mxu1 }
 0x446   : > { %v1537_v8 = vadd.f32 %v1536_v9, %v4263_v53 }
 0x447   : > { %v1571_v10 = vmax.f32 %v1488_v7, 0.0 }
 0x448   : > { %v1572_v12 = vmax.f32 %v1537_v8, 0.0 }
 0x449   : > { %v1591_v13 = vpack.c.bf16 %v1571_v10, %v1569_v58 }
 0x44a   : > { %v1592_v15 = vpack.c.bf16 %v1572_v12, %v1570_v11 }
 0x44b   : > { %1828 = vmatmul.bf16.gmra.mxu2 %v1591_v13  ;;  %1926 = vmatmul.bf16.gmra.mxu0 %v1591_v13 }
 0x44c   : > { %1877 = vmatmul.bf16.gmra.mxu3 %v1592_v15  ;;  %1975 = vmatmul.bf16.gmra.mxu1 %v1592_v15  ;;  %v1490_v16 = vpop.f32.mrf.mxu0 }
 0x44d   : > { %v1539_v21 = vpop.f32.mrf.mxu1  ;;  %v1491_v22 = vadd.f32 %v1490_v16, %v4261_v43 }
 0x44e   : > { %v1540_v23 = vadd.f32 %v1539_v21, %v4263_v53 }
 0x44f   : > { %v1573_v27 = vmax.f32 %v1491_v22, 0.0 }
 0x450   : > { %v1574_v28 = vmax.f32 %v1540_v23, 0.0 }
 0x454   : > { %v1492_v24 = vpop.f32.mrf.mxu0 }
 0x455   : > { %v1493_v25 = vadd.f32 %v1492_v24, %v4261_v43  ;;  %v1541_v18 = vpop.f32.mrf.mxu1 }
 0x456   : > { %v1542_v26 = vadd.f32 %v1541_v18, %v4263_v53 }
 0x457   : > { %v1575_v45 = vmax.f32 %v1493_v25, 0.0 }
 0x458   : > { %v1576_v29 = vmax.f32 %v1542_v26, 0.0 }
 0x459   : > { %v1593_v30 = vpack.c.bf16 %v1575_v45, %v1573_v27 }
 0x45a   : > { %v1594_v31 = vpack.c.bf16 %v1576_v29, %v1574_v28 }
 0x45b   : > { %1833 = vmatmul.bf16.gmra.mxu2 %v1593_v30  ;;  %1931 = vmatmul.bf16.gmra.mxu0 %v1593_v30 }
 0x45c   : > { %1882 = vmatmul.bf16.gmra.mxu3 %v1594_v31  ;;  %1980 = vmatmul.bf16.gmra.mxu1 %v1594_v31  ;;  %v1495_v32 = vpop.f32.mrf.mxu0 }
 0x45d   : > { %v1544_v48 = vpop.f32.mrf.mxu1  ;;  %v1496_v33 = vadd.f32 %v1495_v32, %v4261_v43 }
 0x45e   : > { %v1545_v35 = vadd.f32 %v1544_v48, %v4263_v53 }
 0x45f   : > { %v1577_v39 = vmax.f32 %v1496_v33, 0.0 }
 0x460   : > { %v1578_v41 = vmax.f32 %v1545_v35, 0.0 }
 0x464   : > { %v1497_v36 = vpop.f32.mrf.mxu0 }
 0x465   : > { %v1498_v60 = vadd.f32 %v1497_v36, %v4261_v43  ;;  %v1546_v37 = vpop.f32.mrf.mxu1  ;;  %v1629_v43 = vld [vmem:[%s4478_s13] sm:$0x3] }
 0x466   : > { %v1547_v38 = vadd.f32 %v1546_v37, %v4263_v53  ;;  %v4300_v20 = vperm.slane %v1629_v43, 1  ;;  %v4303_v50 = vperm.slane %v1629_v43, 0 }
 0x467   : > { %v1579_v40 = vmax.f32 %v1498_v60, 0.0 }
 0x468   : > { %v1580_v42 = vmax.f32 %v1547_v38, 0.0 }
 0x469   : > { %v1595_v14 = vpack.c.bf16 %v1579_v40, %v1577_v39 }
 0x46a   : > { %v1596_v44 = vpack.c.bf16 %v1580_v42, %v1578_v41 }
 0x46b   : > { %1838 = vmatmul.bf16.gmra.mxu2 %v1595_v14  ;;  %1936 = vmatmul.bf16.gmra.mxu0 %v1595_v14 }
 0x46c   : > { %1887 = vmatmul.bf16.gmra.mxu3 %v1596_v44  ;;  %1985 = vmatmul.bf16.gmra.mxu1 %v1596_v44 }
 0x478   : > { %v1902_v46 = vpop.f32.mrf.mxu0 }
 0x479   : > { %v1951_v47 = vpop.f32.mrf.mxu1  ;;  %v1903_v53 = vadd.f32 %v1902_v46, %v4300_v20 }
 0x47b   : > { %v1952_v52 = vadd.f32 %v1951_v47, %v1903_v53 }
 0x47d   : > { %v1992_v62 = vmax.f32 %v1952_v52, 0.0 }
 0x47e   : > { %v1804_v61 = vpop.f32.mrf.mxu2 }
 0x47f   : > { %v1853_v51 = vpop.f32.mrf.mxu3  ;;  %v1805_v56 = vadd.f32 %v1804_v61, %v4303_v50 }
 0x480   : > { %v1904_v57 = vpop.f32.mrf.mxu0 }
 0x481   : > { %v1905_v54 = vadd.f32 %v1904_v57, %v4300_v20  ;;  %v1953_v55 = vpop.f32.mrf.mxu1  ;;  %v1854_v1 = vadd.f32 %v1853_v51, %v1805_v56 }
 0x483   : > { %v1954_v59 = vadd.f32 %v1953_v55, %v1905_v54  ;;  %v1991_v9 = vmax.f32 %v1854_v1, 0.0 }
 0x485   : > { %v1994_v63 = vmax.f32 %v1954_v59, 0.0 }
 0x486   : > { %v1806_v0 = vpop.f32.mrf.mxu2 }
 0x487   : > { %v2024_v2 = vpack.c.bf16 %v1994_v63, %v1992_v62  ;;  %v1807_v3 = vadd.f32 %v1806_v0, %v4303_v50  ;;  %v1855_v4 = vpop.f32.mrf.mxu3 }
 0x488   : > { %v1907_v5 = vpop.f32.mrf.mxu0 }
 0x489   : > { %v1856_v6 = vadd.f32 %v1855_v4, %v1807_v3  ;;  %v1956_v7 = vpop.f32.mrf.mxu1  ;;  %2228 = vmatmul.bf16.vlgmr.msrb.gmra.mxu3 %v2024_v2  ;;  %v1908_v58 = vadd.f32 %v1907_v5, %v4300_v20 }
 0x48b   : > { %v1993_v8 = vmax.f32 %v1856_v6, 0.0  ;;  %v1957_v15 = vadd.f32 %v1956_v7, %v1908_v58 }
 0x48d   : > { %v2023_v10 = vpack.c.bf16 %v1993_v8, %v1991_v9  ;;  %v1996_v22 = vmax.f32 %v1957_v15, 0.0 }
 0x48e   : > { %v1809_v11 = vpop.f32.mrf.mxu2 }
 0x48f   : > { %v1858_v12 = vpop.f32.mrf.mxu3  ;;  %2179 = vmatmul.bf16.vlgmr.msrb.gmra.mxu2 %v2023_v10  ;;  %v1810_v19 = vadd.f32 %v1809_v11, %v4303_v50 }
 0x490   : > { %v1909_v13 = vpop.f32.mrf.mxu0 }
 0x491   : > { %v1910_v16 = vadd.f32 %v1909_v13, %v4300_v20  ;;  %v1958_v17 = vpop.f32.mrf.mxu1  ;;  %v1859_v25 = vadd.f32 %v1858_v12, %v1810_v19 }
 0x493   : > { %v1959_v21 = vadd.f32 %v1958_v17, %v1910_v16  ;;  %v1995_v30 = vmax.f32 %v1859_v25, 0.0 }
 0x495   : > { %v1998_v23 = vmax.f32 %v1959_v21, 0.0 }
 0x496   : > { %v1811_v24 = vpop.f32.mrf.mxu2 }
 0x497   : > { %v1812_v18 = vadd.f32 %v1811_v24, %v4303_v50  ;;  %v1860_v26 = vpop.f32.mrf.mxu3  ;;  %v2026_v27 = vpack.c.bf16 %v1998_v23, %v1996_v22 }
 0x498   : > { %v1912_v45 = vpop.f32.mrf.mxu0 }
 0x499   : > { %v1861_v28 = vadd.f32 %v1860_v26, %v1812_v18  ;;  %v1961_v29 = vpop.f32.mrf.mxu1  ;;  %2233 = vmatmul.bf16.gmra.mxu3 %v2026_v27  ;;  %v1913_v32 = vadd.f32 %v1912_v45, %v4300_v20 }
 0x49b   : > { %v1997_v31 = vmax.f32 %v1861_v28, 0.0  ;;  %v1962_v36 = vadd.f32 %v1961_v29, %v1913_v32 }
 0x49d   : > { %v2025_v48 = vpack.c.bf16 %v1997_v31, %v1995_v30  ;;  %v2000_v39 = vmax.f32 %v1962_v36, 0.0 }
 0x49e   : > { %v1814_v33 = vpop.f32.mrf.mxu2 }
 0x49f   : > { %v1863_v34 = vpop.f32.mrf.mxu3  ;;  %2184 = vmatmul.bf16.gmra.mxu2 %v2025_v48  ;;  %v1815_v49 = vadd.f32 %v1814_v33, %v4303_v50 }
 0x4a0   : > { %v1914_v35 = vpop.f32.mrf.mxu0 }
 0x4a1   : > { %v1915_v60 = vadd.f32 %v1914_v35, %v4300_v20  ;;  %v1963_v37 = vpop.f32.mrf.mxu1  ;;  %v1864_v42 = vadd.f32 %v1863_v34, %v1815_v49 }
 0x4a3   : > { %v1964_v38 = vadd.f32 %v1963_v37, %v1915_v60  ;;  %v1999_v61 = vmax.f32 %v1864_v42, 0.0 }
 0x4a5   : > { %v2002_v40 = vmax.f32 %v1964_v38, 0.0 }
 0x4a6   : > { %v1816_v41 = vpop.f32.mrf.mxu2 }
 0x4a7   : > { %v1817_v14 = vadd.f32 %v1816_v41, %v4303_v50  ;;  %v1865_v44 = vpop.f32.mrf.mxu3  ;;  %v2028_v43 = vpack.c.bf16 %v2002_v40, %v2000_v39 }
 0x4a8   : > { %v1917_v46 = vpop.f32.mrf.mxu0 }
 0x4a9   : > { %v1866_v47 = vadd.f32 %v1865_v44, %v1817_v14  ;;  %v1966_v53 = vpop.f32.mrf.mxu1  ;;  %2238 = vmatmul.bf16.gmra.mxu3 %v2028_v43  ;;  %v1918_v57 = vadd.f32 %v1917_v46, %v4300_v20 }
 0x4ab   : > { %v2001_v51 = vmax.f32 %v1866_v47, 0.0  ;;  %v1967_v59 = vadd.f32 %v1966_v53, %v1918_v57 }
 0x4ad   : > { %v2027_v52 = vpack.c.bf16 %v2001_v51, %v1999_v61  ;;  %v2004_v2 = vmax.f32 %v1967_v59, 0.0 }
 0x4ae   : > { %v1819_v54 = vpop.f32.mrf.mxu2 }
 0x4af   : > { %v1868_v55 = vpop.f32.mrf.mxu3  ;;  %2189 = vmatmul.bf16.gmra.mxu2 %v2027_v52  ;;  %v1820_v0 = vadd.f32 %v1819_v54, %v4303_v50 }
 0x4b0   : > { %v1919_v56 = vpop.f32.mrf.mxu0 }
 0x4b1   : > { %v1920_v62 = vadd.f32 %v1919_v56, %v4300_v20  ;;  %v1968_v63 = vpop.f32.mrf.mxu1  ;;  %v1869_v5 = vadd.f32 %v1868_v55, %v1820_v0 }
 0x4b3   : > { %v1969_v1 = vadd.f32 %v1968_v63, %v1920_v62  ;;  %v2003_v11 = vmax.f32 %v1869_v5, 0.0 }
 0x4b5   : > { %v2006_v3 = vmax.f32 %v1969_v1, 0.0 }
 0x4b6   : > { %v1821_v4 = vpop.f32.mrf.mxu2 }
 0x4b7   : > { %v1822_v6 = vadd.f32 %v1821_v4, %v4303_v50  ;;  %v1870_v7 = vpop.f32.mrf.mxu3  ;;  %v2030_v9 = vpack.c.bf16 %v2006_v3, %v2004_v2 }
 0x4b8   : > { %v1922_v8 = vpop.f32.mrf.mxu0 }
 0x4b9   : > { %v1871_v58 = vadd.f32 %v1870_v7, %v1822_v6  ;;  %v1971_v10 = vpop.f32.mrf.mxu1  ;;  %2243 = vmatmul.bf16.gmra.mxu3 %v2030_v9  ;;  %v1923_v13 = vadd.f32 %v1922_v8, %v4300_v20 }
 0x4bb   : > { %v2005_v12 = vmax.f32 %v1871_v58, 0.0  ;;  %v1972_v21 = vadd.f32 %v1971_v10, %v1923_v13 }
 0x4bd   : > { %v2029_v15 = vpack.c.bf16 %v2005_v12, %v2003_v11  ;;  %v2008_v18 = vmax.f32 %v1972_v21, 0.0 }
 0x4be   : > { %v1824_v16 = vpop.f32.mrf.mxu2 }
 0x4bf   : > { %v1873_v17 = vpop.f32.mrf.mxu3  ;;  %2194 = vmatmul.bf16.gmra.mxu2 %v2029_v15  ;;  %v1825_v24 = vadd.f32 %v1824_v16, %v4303_v50 }
 0x4c0   : > { %v1924_v19 = vpop.f32.mrf.mxu0 }
 0x4c1   : > { %v1925_v22 = vadd.f32 %v1924_v19, %v4300_v20  ;;  %v1973_v23 = vpop.f32.mrf.mxu1  ;;  %v1874_v45 = vadd.f32 %v1873_v17, %v1825_v24 }
 0x4c3   : > { %v1974_v25 = vadd.f32 %v1973_v23, %v1925_v22  ;;  %v2007_v33 = vmax.f32 %v1874_v45, 0.0 }
 0x4c5   : > { %v2010_v26 = vmax.f32 %v1974_v25, 0.0 }
 0x4c6   : > { %v1826_v27 = vpop.f32.mrf.mxu2 }
 0x4c7   : > { %v2032_v28 = vpack.c.bf16 %v2010_v26, %v2008_v18  ;;  %v1827_v29 = vadd.f32 %v1826_v27, %v4303_v50  ;;  %v1875_v30 = vpop.f32.mrf.mxu3 }
 0x4c8   : > { %v1927_v31 = vpop.f32.mrf.mxu0 }
 0x4c9   : > { %v1876_v32 = vadd.f32 %v1875_v30, %v1827_v29  ;;  %v1976_v48 = vpop.f32.mrf.mxu1  ;;  %2248 = vmatmul.bf16.gmra.mxu3 %v2032_v28  ;;  %v1928_v36 = vadd.f32 %v1927_v31, %v4300_v20 }
 0x4cb   : > { %v2009_v34 = vmax.f32 %v1876_v32, 0.0  ;;  %v1977_v38 = vadd.f32 %v1976_v48, %v1928_v36 }
 0x4cd   : > { %v2031_v35 = vpack.c.bf16 %v2009_v34, %v2007_v33  ;;  %v2012_v14 = vmax.f32 %v1977_v38, 0.0 }
 0x4ce   : > { %v1829_v60 = vpop.f32.mrf.mxu2 }
 0x4cf   : > { %v1878_v37 = vpop.f32.mrf.mxu3  ;;  %2199 = vmatmul.bf16.gmra.mxu2 %v2031_v35  ;;  %v1830_v41 = vadd.f32 %v1829_v60, %v4303_v50 }
 0x4d0   : > { %v1929_v49 = vpop.f32.mrf.mxu0 }
 0x4d1   : > { %v1930_v39 = vadd.f32 %v1929_v49, %v4300_v20  ;;  %v1978_v40 = vpop.f32.mrf.mxu1  ;;  %v1879_v46 = vadd.f32 %v1878_v37, %v1830_v41  ;;  %v4339_v37 = vld [vmem:[%s4479_s3] ss:$0 sm:$0xff] }
 0x4d3   : > { %v1979_v42 = vadd.f32 %v1978_v40, %v1930_v39  ;;  %v2011_v54 = vmax.f32 %v1879_v46, 0.0 }
 0x4d5   : > { %v2014_v44 = vmax.f32 %v1979_v42, 0.0 }
 0x4d6   : > { %v1831_v43 = vpop.f32.mrf.mxu2 }
 0x4d7   : > { %v2034_v47 = vpack.c.bf16 %v2014_v44, %v2012_v14  ;;  %v1832_v53 = vadd.f32 %v1831_v43, %v4303_v50  ;;  %v1880_v61 = vpop.f32.mrf.mxu3 }
 0x4d8   : > { %v1932_v51 = vpop.f32.mrf.mxu0 }
 0x4d9   : > { %v1881_v57 = vadd.f32 %v1880_v61, %v1832_v53  ;;  %v1981_v52 = vpop.f32.mrf.mxu1  ;;  %2253 = vmatmul.bf16.gmra.mxu3 %v2034_v47  ;;  %v1933_v59 = vadd.f32 %v1932_v51, %v4300_v20 }
 0x4db   : > { %v2013_v55 = vmax.f32 %v1881_v57, 0.0  ;;  %v1982_v1 = vadd.f32 %v1981_v52, %v1933_v59 }
 0x4dd   : > { %v2033_v56 = vpack.c.bf16 %v2013_v55, %v2011_v54  ;;  %v2016_v6 = vmax.f32 %v1982_v1, 0.0 }
 0x4de   : > { %v1834_v62 = vpop.f32.mrf.mxu2 }
 0x4df   : > { %v1883_v63 = vpop.f32.mrf.mxu3  ;;  %2204 = vmatmul.bf16.gmra.mxu2 %v2033_v56  ;;  %v1835_v4 = vadd.f32 %v1834_v62, %v4303_v50 }
 0x4e0   : > { %v1934_v0 = vpop.f32.mrf.mxu0 }
 0x4e1   : > { %v1935_v2 = vadd.f32 %v1934_v0, %v4300_v20  ;;  %v1983_v3 = vpop.f32.mrf.mxu1  ;;  %v1884_v8 = vadd.f32 %v1883_v63, %v1835_v4 }
 0x4e3   : > { %v1984_v5 = vadd.f32 %v1983_v3, %v1935_v2  ;;  %v2015_v16 = vmax.f32 %v1884_v8, 0.0 }
 0x4e5   : > { %v2018_v7 = vmax.f32 %v1984_v5, 0.0 }
 0x4e6   : > { %v1836_v9 = vpop.f32.mrf.mxu2 }
 0x4e7   : > { %v2036_v58 = vpack.c.bf16 %v2018_v7, %v2016_v6  ;;  %v1837_v10 = vadd.f32 %v1836_v9, %v4303_v50  ;;  %v1885_v11 = vpop.f32.mrf.mxu3 }
 0x4e8   : > { %v1937_v12 = vpop.f32.mrf.mxu0 }
 0x4e9   : > { %v1886_v13 = vadd.f32 %v1885_v11, %v1837_v10  ;;  %v1986_v15 = vpop.f32.mrf.mxu1  ;;  %2258 = vmatmul.bf16.gmra.mxu3 %v2036_v58  ;;  %v1938_v21 = vadd.f32 %v1937_v12, %v4300_v20 }
 0x4eb   : > { %v2017_v17 = vmax.f32 %v1886_v13, 0.0  ;;  %v1987_v25 = vadd.f32 %v1986_v15, %v1938_v21 }
 0x4ed   : > { %v2035_v19 = vpack.c.bf16 %v2017_v17, %v2015_v16  ;;  %v2020_v28 = vmax.f32 %v1987_v25, 0.0 }
 0x4ee   : > { %v1839_v22 = vpop.f32.mrf.mxu2 }
 0x4ef   : > { %v1888_v23 = vpop.f32.mrf.mxu3  ;;  %2209 = vmatmul.bf16.gmra.mxu2 %v2035_v19  ;;  %v1840_v27 = vadd.f32 %v1839_v22, %v4303_v50 }
 0x4f0   : > { %v1939_v24 = vpop.f32.mrf.mxu0 }
 0x4f1   : > { %v1940_v18 = vadd.f32 %v1939_v24, %v4300_v20  ;;  %v1988_v26 = vpop.f32.mrf.mxu1  ;;  %v1889_v31 = vadd.f32 %v1888_v23, %v1840_v27 }
 0x4f3   : > { %v1989_v45 = vadd.f32 %v1988_v26, %v1940_v18  ;;  %v2019_v35 = vmax.f32 %v1889_v31, 0.0 }
 0x4f5   : > { %v2022_v29 = vmax.f32 %v1989_v45, 0.0 }
 0x4f6   : > { %v1841_v30 = vpop.f32.mrf.mxu2 }
 0x4f7   : > { %v2038_v32 = vpack.c.bf16 %v2022_v29, %v2020_v28  ;;  %v1842_v48 = vadd.f32 %v1841_v30, %v4303_v50  ;;  %v1890_v33 = vpop.f32.mrf.mxu3 }
 0x4f9   : > { %v1891_v34 = vadd.f32 %v1890_v33, %v1842_v48  ;;  %2263 = vmatmul.bf16.gmra.mxu3 %v2038_v32 }
 0x4fb   : > { %v2021_v36 = vmax.f32 %v1891_v34, 0.0 }
 0x4fd   : > { %v2037_v60 = vpack.c.bf16 %v2021_v36, %v2019_v35 }
 0x4ff   : > { %2214 = vmatmul.bf16.gmra.mxu2 %v2037_v60 }
 0x50c   : > { %v2229_v20 = vpop.f32.mrf.mxu3 }
 0x512   : > { %v2180_v49 = vpop.f32.mrf.mxu2 }
 0x513   : > { %v2181_v38 = vadd.f32 %v4339_v37, %v2180_v49 }
 0x514   : > { %v2231_v39 = vpop.f32.mrf.mxu3 }
 0x515   : > { %v2230_v40 = vadd.f32 %v2229_v20, %v2181_v38 }
 0x517   : > { %2270 = vst [vmem:[%s4343_s12] sm:$0xff] %v2230_v40 }
 0x51a   : > { %v2182_v50 = vpop.f32.mrf.mxu2 }
 0x51b   : > { %v2183_v41 = vadd.f32 %v4339_v37, %v2182_v50 }
 0x51c   : > { %v2234_v42 = vpop.f32.mrf.mxu3 }
 0x51d   : > { %v2232_v14 = vadd.f32 %v2231_v39, %v2183_v41 }
 0x51f   : > { %2271 = vst [vmem:[%s4343_s12 + $0x8] sm:$0xff] %v2232_v14 }
 0x522   : > { %v2185_v44 = vpop.f32.mrf.mxu2 }
 0x523   : > { %v2186_v43 = vadd.f32 %v4339_v37, %v2185_v44 }
 0x524   : > { %v2236_v46 = vpop.f32.mrf.mxu3 }
 0x525   : > { %v2235_v47 = vadd.f32 %v2234_v42, %v2186_v43 }
 0x527   : > { %2272 = vst [vmem:[%s4343_s12 + $0x10] sm:$0xff] %v2235_v47 }
 0x52a   : > { %v2187_v53 = vpop.f32.mrf.mxu2 }
 0x52b   : > { %v2188_v61 = vadd.f32 %v4339_v37, %v2187_v53 }
 0x52c   : > { %v2239_v51 = vpop.f32.mrf.mxu3 }
 0x52d   : > { %v2237_v57 = vadd.f32 %v2236_v46, %v2188_v61 }
 0x52f   : > { %2273 = vst [vmem:[%s4343_s12 + $0x18] sm:$0xff] %v2237_v57 }
 0x532   : > { %v2190_v52 = vpop.f32.mrf.mxu2 }
 0x533   : > { %v2191_v54 = vadd.f32 %v4339_v37, %v2190_v52 }
 0x534   : > { %v2241_v55 = vpop.f32.mrf.mxu3 }
 0x535   : > { %v2240_v56 = vadd.f32 %v2239_v51, %v2191_v54 }
 0x537   : > { %2274 = vst [vmem:[%s4343_s12 + $0x20] sm:$0xff] %v2240_v56 }
 0x53a   : > { %v2192_v59 = vpop.f32.mrf.mxu2 }
 0x53b   : > { %v2193_v62 = vadd.f32 %v4339_v37, %v2192_v59 }
 0x53c   : > { %v2244_v63 = vpop.f32.mrf.mxu3 }
 0x53d   : > { %v2242_v0 = vadd.f32 %v2241_v55, %v2193_v62 }
 0x53f   : > { %2275 = vst [vmem:[%s4343_s12 + $0x28] sm:$0xff] %v2242_v0 }
 0x542   : > { %v2195_v1 = vpop.f32.mrf.mxu2 }
 0x543   : > { %v2196_v2 = vadd.f32 %v4339_v37, %v2195_v1 }
 0x544   : > { %v2246_v3 = vpop.f32.mrf.mxu3 }
 0x545   : > { %v2245_v4 = vadd.f32 %v2244_v63, %v2196_v2 }
 0x547   : > { %2276 = vst [vmem:[%s4343_s12 + $0x30] sm:$0xff] %v2245_v4 }
 0x54a   : > { %v2197_v5 = vpop.f32.mrf.mxu2 }
 0x54b   : > { %v2198_v6 = vadd.f32 %v4339_v37, %v2197_v5 }
 0x54c   : > { %v2249_v7 = vpop.f32.mrf.mxu3 }
 0x54d   : > { %v2247_v9 = vadd.f32 %v2246_v3, %v2198_v6 }
 0x54f   : > { %2277 = vst [vmem:[%s4343_s12 + $0x38] sm:$0xff] %v2247_v9 }
 0x552   : > { %v2200_v8 = vpop.f32.mrf.mxu2 }
 0x553   : > { %v2201_v58 = vadd.f32 %v4339_v37, %v2200_v8 }
 0x554   : > { %v2251_v10 = vpop.f32.mrf.mxu3 }
 0x555   : > { %v2250_v11 = vadd.f32 %v2249_v7, %v2201_v58 }
 0x557   : > { %2278 = vst [vmem:[%s4343_s12 + $0x40] sm:$0xff] %v2250_v11 }
 0x55a   : > { %v2202_v12 = vpop.f32.mrf.mxu2 }
 0x55b   : > { %v2203_v13 = vadd.f32 %v4339_v37, %v2202_v12 }
 0x55c   : > { %v2254_v15 = vpop.f32.mrf.mxu3 }
 0x55d   : > { %v2252_v16 = vadd.f32 %v2251_v10, %v2203_v13 }
 0x55f   : > { %2279 = vst [vmem:[%s4343_s12 + $0x48] sm:$0xff] %v2252_v16 }
 0x562   : > { %v2205_v17 = vpop.f32.mrf.mxu2 }
 0x563   : > { %v2206_v19 = vadd.f32 %v4339_v37, %v2205_v17 }
 0x564   : > { %v2256_v21 = vpop.f32.mrf.mxu3 }
 0x565   : > { %v2255_v22 = vadd.f32 %v2254_v15, %v2206_v19 }
 0x567   : > { %2280 = vst [vmem:[%s4343_s12 + $0x50] sm:$0xff] %v2255_v22 }
 0x56a   : > { %v2207_v23 = vpop.f32.mrf.mxu2 }
 0x56b   : > { %v2208_v24 = vadd.f32 %v4339_v37, %v2207_v23 }
 0x56c   : > { %v2259_v18 = vpop.f32.mrf.mxu3 }
 0x56d   : > { %v2257_v25 = vadd.f32 %v2256_v21, %v2208_v24 }
 0x56f   : > { %2281 = vst [vmem:[%s4343_s12 + $0x58] sm:$0xff] %v2257_v25 }
 0x572   : > { %v2210_v26 = vpop.f32.mrf.mxu2 }
 0x573   : > { %v2211_v27 = vadd.f32 %v4339_v37, %v2210_v26 }
 0x574   : > { %v2261_v28 = vpop.f32.mrf.mxu3 }
 0x575   : > { %v2260_v45 = vadd.f32 %v2259_v18, %v2211_v27 }
 0x577   : > { %2282 = vst [vmem:[%s4343_s12 + $0x60] sm:$0xff] %v2260_v45 }
 0x57a   : > { %v2212_v29 = vpop.f32.mrf.mxu2 }
 0x57b   : > { %v2213_v30 = vadd.f32 %v4339_v37, %v2212_v29 }
 0x57c   : > { %v2264_v32 = vpop.f32.mrf.mxu3 }
 0x57d   : > { %v2262_v31 = vadd.f32 %v2261_v28, %v2213_v30 }
 0x57f   : > { %2283 = vst [vmem:[%s4343_s12 + $0x68] sm:$0xff] %v2262_v31 }
 0x582   : > { %v2215_v48 = vpop.f32.mrf.mxu2 }
 0x583   : > { %v2216_v33 = vadd.f32 %v4339_v37, %v2215_v48 }
 0x584   : > { %v2266_v60 = vpop.f32.mrf.mxu3 }
 0x585   : > { %v2265_v34 = vadd.f32 %v2264_v32, %v2216_v33 }
 0x587   : > { %2284 = vst [vmem:[%s4343_s12 + $0x70] sm:$0xff] %v2265_v34 }
 0x58a   : > { %v2217_v35 = vpop.f32.mrf.mxu2 }
 0x58b   : > { %v2218_v36 = vadd.f32 %v4339_v37, %v2217_v35 }
 0x58d   : > { %v2267_v20 = vadd.f32 %v2266_v60, %v2218_v36 }
 0x58f   : > { %2285 = vst [vmem:[%s4343_s12 + $0x78] sm:$0xff] %v2267_v20 }
 0x590 PF: > { %s4480_s9 = sadd.s32 4294967295, %s3689_s30   ;;  %s4481_s1 = sld [smem:[#allocation41_spill]] }
 0x591   : > { %p3187_p2 = scmp.eq.s32.totalorder %s4480_s9, 11  ;;  %s3705_s5 = smov [#allocation20]  }
 0x592   : > { %s2291_s6 = sshll.u32 %s3705_s5, 4  ;;  %s3706_s8 = smov 128   ;;  %s2292_s6 = int_to_ptr.vmem [resolvable:$true] %s2291_s6 }
 0x593   : > { %s3707_s14 = smov 8  }
 0x596   : > { %s2293_s4 = sshll.u32 %s4481_s1, 4  ;;  %s2294_s4 = int_to_ptr.hbm [resolvable:$true] %s2293_s4 }
 0x597   : > { %3138 = dma.vmem_to_hbm [thread:$0]  (%p3187_p2), %s2292_s6, 4096, %s2294_s4, [#allocation7], %s3706_s8, %s3706_s8, %s3707_s14  }
 0x598   : > { %3648 = dma.done.wait (%p3187_p2), [#allocation7], 4096  }
 0x599   : > { %3650 = vsyncadd (%p3187_p2), [#allocation7], 4294963200 }
 0x59a PF: > { %s30_s30 = sadd.s32 1, %s3689_s30   ;;  %s4482_s16 = smov %s4497_s24 }
 0x59b   : > { %p27_p4 = scmp.ge.s32.totalorder %s30_s30, 14   ;;  %s4483_s21 = smov %s3657_s22 }
 0x59c   : > { %s4484_s22 = smov %s3661_s23  ;;  %s4485_s23 = smov %s3934_s11 }
 0x59d   : > { %s4486_s24 = smov %s3677_s27  ;;  %s4487_s25 = smov %s3681_s28 }
 0x59e   : > { %s4488_s26 = smov %s3685_s29  ;;  %s4489_s27 = smov %s4493_s7 }
 0x59f   : > { %s4490_s28 = smov %s4482_s16  ;;  %s4491_s29 = smov %s4501_s18 }
 0x5a0   :  { %29 = sbr.rel (!%p27_p4) target bundleno = 23 (0x17), region = 167 }
 0x5a5   :  { %2310 = vsyncpa [#allocation6], 1 }
 0x5a6   :  { %2312 = vsyncpa [#allocation6 + $0x1], 1 }
 0x5a7   :  { %2313 = vsyncpa [#allocation9], 1 }
 0x5a8   :  { %2314 = vsyncpa [#allocation12], 1 }
 0x5a9   :  { %2315 = vsyncpa [#allocation15], 1 }
 0x5aa   :  { %2316 = vsyncpa [#allocation18], 1 }
 0x5ab   :  { %2317 = vsyncpa [#allocation7], 1 }
 0x5ac   :  { %2319 = vsyncpa [#allocation7 + $0x1], 1 }

</bundles_post_ra>
